<compile_context>
chip_gen: v6e
topology: v6e:2x2x1
jax: 0.10.0
libtpu: 0.0.40
codegen_flags: <defaults>
</compile_context>

<pallas_src>
import functools

import jax
import jax.numpy as jnp
from jax.experimental import pallas as pl
from jax.experimental.pallas import tpu as pltpu


# -----------------------------------------------------------------------------
# Kernel body: the whole MLP hot path fused (4 matmuls + 3 ReLUs).
# -----------------------------------------------------------------------------
def _mlp_kernel(x_ref,
                w0_ref, b0_ref,
                w1_ref, b1_ref,
                w2_ref, b2_ref,
                w3_ref, b3_ref,
                o_ref):
    """Matmul inputs are bf16, accumulation is f32 on the MXU; bias add / ReLU /
    final cast are VPU filler hidden under the matmuls."""
    x = x_ref[...].astype(jnp.bfloat16)

    # Linear 0: in_dim -> hidden
    h = jnp.dot(x, w0_ref[...], preferred_element_type=jnp.float32) + b0_ref[...]
    # ReLU -> Linear 1: hidden -> hidden
    h = jnp.maximum(h, 0.0).astype(jnp.bfloat16)
    h = jnp.dot(h, w1_ref[...], preferred_element_type=jnp.float32) + b1_ref[...]
    # ReLU -> Linear 2: hidden -> hidden
    h = jnp.maximum(h, 0.0).astype(jnp.bfloat16)
    h = jnp.dot(h, w2_ref[...], preferred_element_type=jnp.float32) + b2_ref[...]
    # ReLU -> Linear 3 (output head): hidden -> out_dim*num_token
    h = jnp.maximum(h, 0.0).astype(jnp.bfloat16)
    y = jnp.dot(h, w3_ref[...], preferred_element_type=jnp.float32) + b3_ref[...]

    o_ref[...] = y.astype(o_ref.dtype)


# -----------------------------------------------------------------------------
# Hardware-aware tiling helpers.
# -----------------------------------------------------------------------------
def _tpu_hw_info():
    """(physical VMEM bytes, #TensorCores per chip) with conservative fallbacks
    (v7x: 64 MiB, 2 TCs) if the trace-time query is unavailable."""
    vmem_bytes = 64 * 1024 * 1024
    num_tc = 2
    try:
        info = pltpu.get_tpu_info()
        for attr in ("vmem_capacity_bytes", "vmem_bytes", "vmem_size_bytes"):
            v = getattr(info, attr, None)
            if v:
                vmem_bytes = int(v)
                break
        for attr in ("num_tensorcores", "tensorcores_per_chip", "num_cores",
                     "core_count"):
            v = getattr(info, attr, None)
            if v:
                num_tc = int(v)
                break
    except Exception:
        pass
    return vmem_bytes, num_tc


def _choose_batch_tile(batch, in_dim, hidden, out_features, out_itemsize,
                       vmem_budget, min_grid_steps):
    """Largest batch tile (multiple of 8, dividing batch) that (a) yields at
    least `min_grid_steps` grid steps (2 per TensorCore) so per-TC pipelining
    hides the output writeback, and (b) fits the VMEM budget."""
    def footprint(tb):
        # x (f32) and output tiles, double-buffered by the pipeline.
        x_out = 2 * tb * (in_dim * 4 + out_features * out_itemsize)
        # Weights (bf16): counted double-buffered to stay safe even when the
        # Buffered(1) single-buffer hint is unavailable.  Biases f32.
        w = 2 * 2 * (in_dim * hidden + 2 * hidden * hidden + hidden * out_features)
        b = 2 * 4 * (3 * hidden + out_features)
        return x_out + w + b

    if batch < 16 or batch % 8 != 0:
        return batch  # a full-array block is always a legal BlockSpec
    candidates = [t for t in (1024, 512, 256, 128) if batch % t == 0]
    # Preferred: >= min_grid_steps steps and fits VMEM.
    for tb in candidates:
        if batch // tb >= min_grid_steps and footprint(tb) <= vmem_budget:
            return tb
    # Relaxed: >= 2 total steps (still overlaps writeback with compute).
    for tb in candidates:
        if batch // tb >= 2 and footprint(tb) <= vmem_budget:
            return tb
    # Last resort: tiles below 128 (per-step overhead starts to dominate).
    for tb in (64, 32, 16, 8):
        if batch % tb == 0 and batch // tb >= 2 and footprint(tb) <= vmem_budget:
            return tb
    return batch


def _const_block_spec(shape):
    """BlockSpec for an operand whose block never changes across grid steps
    (weights / biases): fetched once.  Single-buffered via Buffered(1) when
    supported — the second buffer would never be used, so this halves the
    weight VMEM footprint (matters once hidden/out_features grow on v7x)."""
    index_map = lambda i: (0,) * len(shape)
    if hasattr(pl, "Buffered"):
        try:
            return pl.BlockSpec(shape, index_map, pipeline_mode=pl.Buffered(1))
        except TypeError:
            pass  # older JAX without pipeline_mode: fall back to the default.
    return pl.BlockSpec(shape, index_map)


# -----------------------------------------------------------------------------
# Public forward.
# -----------------------------------------------------------------------------
def light2token_forward(x, params, *, out_dim, num_token,
                        out_dtype=jnp.bfloat16, batch_tile=None):
    """x: [batch, in_dim] float32.  Returns y: [batch, num_token, out_dim].

    `params` is [(w0,b0),(w1,b1),(w2,b2),(w3,b3)] with weights stored as
    [in_features, out_features] (bf16 recommended; w0's fan-in may be
    zero-padded, see prepare_params) and biases [1, out_features] f32 — i.e.
    the kernel computes plain `x @ W + b` per layer.

    out_dtype defaults to bf16 (halves the dominant output HBM writeback);
    pass jnp.float32 if bit-closer parity with the f32 module is required.
    """
    assert x.ndim == 2
    batch, in_dim = x.shape
    assert len(params) == 4, "kernel is specialized to hidden_layers=2"
    (w0, b0), (w1, b1), (w2, b2), (w3, b3) = params
    in_dim_k = w0.shape[0]
    hidden = w0.shape[1]
    out_features = w3.shape[1]
    assert out_features == out_dim * num_token
    assert in_dim_k >= in_dim

    # Zero-pad x's feature dim to the (possibly padded) w0 fan-in: removes
    # masked partial-lane loads for the in_dim=27 case (padded to 32).
    if in_dim_k != in_dim:
        x = jnp.pad(x, ((0, 0), (0, in_dim_k - in_dim)))

    out_itemsize = jnp.dtype(out_dtype).itemsize
    vmem_bytes, num_tc = _tpu_hw_info()
    # Generation-aware scoped-VMEM budget with headroom (v5e/v6e physical
    # 128 MiB -> <=28 MiB; v7x 64 MiB physical -> 16 MiB), plus an explicit
    # vmem limit slightly above it so tile selection is stable across chips.
    vmem_budget = int(min(max(vmem_bytes // 4, 12 * 2**20), 28 * 2**20))
    vmem_limit = int(min(vmem_budget + 4 * 2**20, 32 * 2**20))

    if batch_tile is None:
        tb = _choose_batch_tile(batch, in_dim_k, hidden, out_features,
                                out_itemsize, vmem_budget,
                                min_grid_steps=2 * max(num_tc, 1))
    else:
        tb = batch_tile
    assert batch % tb == 0
    assert tb == batch or tb % 8 == 0, "batch tile must satisfy the (8,128) rule"

    # Advisory cost estimate for XLA's scheduler (whole call).
    flops = 2 * batch * (in_dim_k * hidden + 2 * hidden * hidden
                         + hidden * out_features)
    bytes_accessed = int(
        x.size * x.dtype.itemsize
        + batch * out_features * out_itemsize
        + sum(int(w.size) * w.dtype.itemsize + int(b.size) * b.dtype.itemsize
              for (w, b) in params))
    cost = pl.CostEstimate(flops=flops, transcendentals=0,
                           bytes_accessed=bytes_accessed)

    y2d = pl.pallas_call(
        _mlp_kernel,
        out_shape=jax.ShapeDtypeStruct((batch, out_features), out_dtype),
        grid_spec=pltpu.PrefetchScalarGridSpec(
            num_scalar_prefetch=0,
            grid=(batch // tb,),
            in_specs=[
                pl.BlockSpec((tb, in_dim_k), lambda i: (i, 0)),   # x tile over batch
                _const_block_spec((in_dim_k, hidden)),            # layer 0
                _const_block_spec((1, hidden)),
                _const_block_spec((hidden, hidden)),              # layer 1
                _const_block_spec((1, hidden)),
                _const_block_spec((hidden, hidden)),              # layer 2
                _const_block_spec((1, hidden)),
                _const_block_spec((hidden, out_features)),        # output head
                _const_block_spec((1, out_features)),
            ],
            out_specs=pl.BlockSpec((tb, out_features), lambda i: (i, 0)),
        ),
        compiler_params=pltpu.CompilerParams(
            dimension_semantics=("parallel",),
            vmem_limit_bytes=vmem_limit),
        cost_estimate=cost,
    )(x, w0, b0, w1, b1, w2, b2, w3, b3)

    return y2d.reshape(batch, num_token, out_dim)


# -----------------------------------------------------------------------------
# Parameter construction (mirrors the PyTorch module's __init__).
# -----------------------------------------------------------------------------
def init_params(key, in_dim, hidden_dim, hidden_layers, out_dim, num_token,
                target=0.0):
    """f32, PyTorch-style init: Linear default U(-1/sqrt(fan_in), 1/sqrt(fan_in));
    final layer per initialize_weights_of_last_output: weight=0, bias=target.
    Weights stored as [in_features, out_features]."""
    dims = [in_dim] + [hidden_dim] * (hidden_layers + 1)
    params = []
    for fan_in, fan_out in zip(dims[:-1], dims[1:]):
        key, kw, kb = jax.random.split(key, 3)
        bound = 1.0 / float(fan_in) ** 0.5
        w = jax.random.uniform(kw, (fan_in, fan_out), jnp.float32, -bound, bound)
        b = jax.random.uniform(kb, (1, fan_out), jnp.float32, -bound, bound)
        params.append((w, b))
    out_features = out_dim * num_token
    w_last = jnp.zeros((hidden_dim, out_features), jnp.float32)
    b_last = jnp.full((1, out_features), target, jnp.float32)
    params.append((w_last, b_last))
    return params


def prepare_params(params, *, weight_dtype=jnp.bfloat16, in_dim_pad_to=8):
    """Kernel-side param prep: weights in bf16 (halves weight DMA), biases f32,
    and w0's fan-in zero-padded up to a multiple of `in_dim_pad_to` (27 -> 32,
    mathematically identical since x is zero-padded to match)."""
    (w0, b0), *rest = params
    pad = (-w0.shape[0]) % in_dim_pad_to
    if pad:
        w0 = jnp.pad(w0, ((0, pad), (0, 0)))
    prepped = [(w0.astype(weight_dtype), b0)]
    prepped += [(w.astype(weight_dtype), b) for (w, b) in rest]
    return prepped


def _reference_forward(x, params, out_dim, num_token):
    """Pure-JAX f32 reference (unpadded f32 params)."""
    (w0, b0), (w1, b1), (w2, b2), (w3, b3) = [
        (w.astype(jnp.float32), b.astype(jnp.float32)) for (w, b) in params]
    h = x @ w0 + b0
    h = jnp.maximum(h, 0.0) @ w1 + b1
    h = jnp.maximum(h, 0.0) @ w2 + b2
    h = jnp.maximum(h, 0.0) @ w3 + b3
    return h.reshape(x.shape[0], num_token, out_dim)


if __name__ == "__main__":
    # Module defaults: in_dim=27, hidden_dim=256, hidden_layers=2, out_dim=768,
    # num_token=1.  batch=512 gives a 4-step batch grid (>= 2 steps per v7x TC).
    batch = 512
    in_dim = 27
    hidden_dim = 256
    hidden_layers = 2
    out_dim = 768
    num_token = 1

    key = jax.random.PRNGKey(0)
    key, kx = jax.random.split(key)
    x = jax.random.normal(kx, (batch, in_dim), jnp.float32)

    fwd = jax.jit(functools.partial(light2token_forward,
                                    out_dim=out_dim, num_token=num_token))

    # --- Check 1: module-faithful init (last layer W=0, b=target=0) ----------
    params0_f32 = init_params(key, in_dim, hidden_dim, hidden_layers,
                              out_dim, num_token, target=0.0)
    params0 = prepare_params(params0_f32)
    y0 = fwd(x, params0)
    jax.block_until_ready(y0)
    assert y0.shape == (batch, num_token, out_dim), y0.shape
    assert jnp.allclose(y0.astype(jnp.float32), 0.0, atol=1e-6), \
        "zero-init output head must reproduce the target"

    # --- Check 2: random output head so all 4 matmuls are exercised ----------
    key, kw, kb = jax.random.split(key, 3)
    bound = 1.0 / float(hidden_dim) ** 0.5
    w_last = jax.random.uniform(kw, (hidden_dim, out_dim * num_token),
                                jnp.float32, -bound, bound)
    b_last = jax.random.uniform(kb, (1, out_dim * num_token),
                                jnp.float32, -bound, bound)
    params1_f32 = params0_f32[:3] + [(w_last, b_last)]
    params1 = prepare_params(params1_f32)

    y1 = fwd(x, params1)
    jax.block_until_ready(y1)
    y1_ref = _reference_forward(x, params1_f32, out_dim, num_token)
    # bf16 matmul inputs + bf16 output vs f32 reference: loose tolerance.
    max_err = float(jnp.max(jnp.abs(y1.astype(jnp.float32) - y1_ref)))
    assert jnp.allclose(y1.astype(jnp.float32), y1_ref, atol=5e-2, rtol=5e-2), max_err

    print("KERNEL_OK")
</pallas_src>

<mosaic_0001>
module attributes {stable_mosaic.version = 11 : i64} {
  func.func @_mlp_kernel(%arg0: i32, %arg1: memref<128x32xf32, #tpu.memory_space<vmem>>, %arg2: memref<32x256xbf16, #tpu.memory_space<vmem>>, %arg3: memref<1x256xf32, #tpu.memory_space<vmem>>, %arg4: memref<256x256xbf16, #tpu.memory_space<vmem>>, %arg5: memref<1x256xf32, #tpu.memory_space<vmem>>, %arg6: memref<256x256xbf16, #tpu.memory_space<vmem>>, %arg7: memref<1x256xf32, #tpu.memory_space<vmem>>, %arg8: memref<256x768xbf16, #tpu.memory_space<vmem>>, %arg9: memref<1x768xf32, #tpu.memory_space<vmem>>, %arg10: memref<128x768xbf16, #tpu.memory_space<vmem>>) attributes {dimension_semantics = [#tpu.dimension_semantics<parallel>], iteration_bounds = array<i64: 4>, scalar_prefetch = 0 : i64, scratch_operands = 0 : i64, tpu.core_type = #tpu.core_type<tc>, window_params = [{transform_indices = @transform_0, window_bounds = array<i64: 128, 32>}, {pipeline_mode = #tpu.pipeline_mode<synchronous>, transform_indices = @transform_1, window_bounds = array<i64: 32, 256>}, {pipeline_mode = #tpu.pipeline_mode<synchronous>, transform_indices = @transform_2, window_bounds = array<i64: 1, 256>}, {pipeline_mode = #tpu.pipeline_mode<synchronous>, transform_indices = @transform_3, window_bounds = array<i64: 256, 256>}, {pipeline_mode = #tpu.pipeline_mode<synchronous>, transform_indices = @transform_4, window_bounds = array<i64: 1, 256>}, {pipeline_mode = #tpu.pipeline_mode<synchronous>, transform_indices = @transform_5, window_bounds = array<i64: 256, 256>}, {pipeline_mode = #tpu.pipeline_mode<synchronous>, transform_indices = @transform_6, window_bounds = array<i64: 1, 256>}, {pipeline_mode = #tpu.pipeline_mode<synchronous>, transform_indices = @transform_7, window_bounds = array<i64: 256, 768>}, {pipeline_mode = #tpu.pipeline_mode<synchronous>, transform_indices = @transform_8, window_bounds = array<i64: 1, 768>}, {transform_indices = @transform_9, window_bounds = array<i64: 128, 768>}]} {
    %c0 = arith.constant 0 : index
    %c0_0 = arith.constant 0 : index
    %0 = vector.load %arg1[%c0, %c0_0] : memref<128x32xf32, #tpu.memory_space<vmem>>, vector<128x32xf32>
    %1 = arith.truncf %0 : vector<128x32xf32> to vector<128x32xbf16>
    %c0_1 = arith.constant 0 : index
    %c0_2 = arith.constant 0 : index
    %2 = vector.load %arg2[%c0_1, %c0_2] : memref<32x256xbf16, #tpu.memory_space<vmem>>, vector<32x256xbf16>
    %cst = arith.constant dense<0.000000e+00> : vector<128x256xf32>
    %3 = tpu.matmul %1, %2, %cst {dimension_numbers = #tpu.dot_dimension_numbers<[1], [0], [0], [1], [0, 0, 1, 1], [], []>} : vector<128x32xbf16>, vector<32x256xbf16>, vector<128x256xf32> -> vector<128x256xf32>
    %c0_3 = arith.constant 0 : index
    %c0_4 = arith.constant 0 : index
    %4 = vector.load %arg3[%c0_3, %c0_4] : memref<1x256xf32, #tpu.memory_space<vmem>>, vector<1x256xf32>
    %5 = vector.broadcast %4 : vector<1x256xf32> to vector<128x256xf32>
    %6 = arith.addf %3, %5 : vector<128x256xf32>
    %cst_5 = arith.constant 0.000000e+00 : f32
    %7 = vector.broadcast %cst_5 : f32 to vector<128x256xf32>
    %8 = arith.maximumf %6, %7 : vector<128x256xf32>
    %9 = arith.truncf %8 : vector<128x256xf32> to vector<128x256xbf16>
    %c0_6 = arith.constant 0 : index
    %c0_7 = arith.constant 0 : index
    %10 = vector.load %arg4[%c0_6, %c0_7] : memref<256x256xbf16, #tpu.memory_space<vmem>>, vector<256x256xbf16>
    %cst_8 = arith.constant dense<0.000000e+00> : vector<128x256xf32>
    %11 = tpu.matmul %9, %10, %cst_8 {dimension_numbers = #tpu.dot_dimension_numbers<[1], [0], [0], [1], [0, 0, 1, 1], [], []>} : vector<128x256xbf16>, vector<256x256xbf16>, vector<128x256xf32> -> vector<128x256xf32>
    %c0_9 = arith.constant 0 : index
    %c0_10 = arith.constant 0 : index
    %12 = vector.load %arg5[%c0_9, %c0_10] : memref<1x256xf32, #tpu.memory_space<vmem>>, vector<1x256xf32>
    %13 = vector.broadcast %12 : vector<1x256xf32> to vector<128x256xf32>
    %14 = arith.addf %11, %13 : vector<128x256xf32>
    %cst_11 = arith.constant 0.000000e+00 : f32
    %15 = vector.broadcast %cst_11 : f32 to vector<128x256xf32>
    %16 = arith.maximumf %14, %15 : vector<128x256xf32>
    %17 = arith.truncf %16 : vector<128x256xf32> to vector<128x256xbf16>
    %c0_12 = arith.constant 0 : index
    %c0_13 = arith.constant 0 : index
    %18 = vector.load %arg6[%c0_12, %c0_13] : memref<256x256xbf16, #tpu.memory_space<vmem>>, vector<256x256xbf16>
    %cst_14 = arith.constant dense<0.000000e+00> : vector<128x256xf32>
    %19 = tpu.matmul %17, %18, %cst_14 {dimension_numbers = #tpu.dot_dimension_numbers<[1], [0], [0], [1], [0, 0, 1, 1], [], []>} : vector<128x256xbf16>, vector<256x256xbf16>, vector<128x256xf32> -> vector<128x256xf32>
    %c0_15 = arith.constant 0 : index
    %c0_16 = arith.constant 0 : index
    %20 = vector.load %arg7[%c0_15, %c0_16] : memref<1x256xf32, #tpu.memory_space<vmem>>, vector<1x256xf32>
    %21 = vector.broadcast %20 : vector<1x256xf32> to vector<128x256xf32>
    %22 = arith.addf %19, %21 : vector<128x256xf32>
    %cst_17 = arith.constant 0.000000e+00 : f32
    %23 = vector.broadcast %cst_17 : f32 to vector<128x256xf32>
    %24 = arith.maximumf %22, %23 : vector<128x256xf32>
    %25 = arith.truncf %24 : vector<128x256xf32> to vector<128x256xbf16>
    %c0_18 = arith.constant 0 : index
    %c0_19 = arith.constant 0 : index
    %26 = vector.load %arg8[%c0_18, %c0_19] : memref<256x768xbf16, #tpu.memory_space<vmem>>, vector<256x768xbf16>
    %cst_20 = arith.constant dense<0.000000e+00> : vector<128x768xf32>
    %27 = tpu.matmul %25, %26, %cst_20 {dimension_numbers = #tpu.dot_dimension_numbers<[1], [0], [0], [1], [0, 0, 1, 1], [], []>} : vector<128x256xbf16>, vector<256x768xbf16>, vector<128x768xf32> -> vector<128x768xf32>
    %c0_21 = arith.constant 0 : index
    %c0_22 = arith.constant 0 : index
    %28 = vector.load %arg9[%c0_21, %c0_22] : memref<1x768xf32, #tpu.memory_space<vmem>>, vector<1x768xf32>
    %29 = vector.broadcast %28 : vector<1x768xf32> to vector<128x768xf32>
    %30 = arith.addf %27, %29 : vector<128x768xf32>
    %31 = arith.truncf %30 : vector<128x768xf32> to vector<128x768xbf16>
    %c0_23 = arith.constant 0 : index
    %c0_24 = arith.constant 0 : index
    %32 = vector.load %arg10[%c0_23, %c0_24] : memref<128x768xbf16, #tpu.memory_space<vmem>>, vector<128x768xbf16>
    tpu.vector_store %arg10[%c0_23, %c0_24], %31 {strides = array<i32>} : memref<128x768xbf16, #tpu.memory_space<vmem>>, vector<128x768xbf16>,
    return
  }
  func.func @transform_0(%arg0: i32) -> (i32, i32) {
    %c0_i32 = arith.constant 0 : i32
    %c0_i32_0 = arith.constant 0 : i32
    return %arg0, %c0_i32 : i32, i32
  }
  func.func @transform_1(%arg0: i32) -> (i32, i32) {
    %c0_i32 = arith.constant 0 : i32
    %c0_i32_0 = arith.constant 0 : i32
    %c0_i32_1 = arith.constant 0 : i32
    return %c0_i32, %c0_i32_0 : i32, i32
  }
  func.func @transform_2(%arg0: i32) -> (i32, i32) {
    %c0_i32 = arith.constant 0 : i32
    %c0_i32_0 = arith.constant 0 : i32
    %c0_i32_1 = arith.constant 0 : i32
    return %c0_i32, %c0_i32_0 : i32, i32
  }
  func.func @transform_3(%arg0: i32) -> (i32, i32) {
    %c0_i32 = arith.constant 0 : i32
    %c0_i32_0 = arith.constant 0 : i32
    %c0_i32_1 = arith.constant 0 : i32
    return %c0_i32, %c0_i32_0 : i32, i32
  }
  func.func @transform_4(%arg0: i32) -> (i32, i32) {
    %c0_i32 = arith.constant 0 : i32
    %c0_i32_0 = arith.constant 0 : i32
    %c0_i32_1 = arith.constant 0 : i32
    return %c0_i32, %c0_i32_0 : i32, i32
  }
  func.func @transform_5(%arg0: i32) -> (i32, i32) {
    %c0_i32 = arith.constant 0 : i32
    %c0_i32_0 = arith.constant 0 : i32
    %c0_i32_1 = arith.constant 0 : i32
    return %c0_i32, %c0_i32_0 : i32, i32
  }
  func.func @transform_6(%arg0: i32) -> (i32, i32) {
    %c0_i32 = arith.constant 0 : i32
    %c0_i32_0 = arith.constant 0 : i32
    %c0_i32_1 = arith.constant 0 : i32
    return %c0_i32, %c0_i32_0 : i32, i32
  }
  func.func @transform_7(%arg0: i32) -> (i32, i32) {
    %c0_i32 = arith.constant 0 : i32
    %c0_i32_0 = arith.constant 0 : i32
    %c0_i32_1 = arith.constant 0 : i32
    return %c0_i32, %c0_i32_0 : i32, i32
  }
  func.func @transform_8(%arg0: i32) -> (i32, i32) {
    %c0_i32 = arith.constant 0 : i32
    %c0_i32_0 = arith.constant 0 : i32
    %c0_i32_1 = arith.constant 0 : i32
    return %c0_i32, %c0_i32_0 : i32, i32
  }
  func.func @transform_9(%arg0: i32) -> (i32, i32) {
    %c0_i32 = arith.constant 0 : i32
    %c0_i32_0 = arith.constant 0 : i32
    return %arg0, %c0_i32 : i32, i32
  }
}

</mosaic_0001>

<bundles_post_ra>
// kernel: light2token_forward.1
= control target key start
LH: loop header
LB: loop body
LE: loop exit
PB: predicated region body
PF: predicated region fallthrough
CT: control target
= control target key end

     0   :  { %14 = vsyncpa [#allocation3], 0  ;;  %s4386_s0 = inlined_call_operand.vmem [shape: f32[512,32], index: 0, kind: input, shape index: {}]   ;;  %s4387_s1 = inlined_call_operand.vmem [shape: bf16[32,256], index: 1, kind: input, shape index: {}]   ;;  %s4388_s2 = inlined_call_operand.vmem [shape: f32[1,256], index: 2, kind: input, shape index: {}]   ;;  %s4389_s3 = inlined_call_operand.vmem [shape: bf16[256,256], index: 3, kind: input, shape index: {}]   ;;  %s4390_s4 = inlined_call_operand.vmem [shape: f32[1,256], index: 4, kind: input, shape index: {}]   ;;  %s4391_s5 = inlined_call_operand.vmem [shape: bf16[256,256], index: 5, kind: input, shape index: {}]   ;;  %s4392_s6 = inlined_call_operand.vmem [shape: f32[1,256], index: 6, kind: input, shape index: {}]   ;;  %s4393_s7 = inlined_call_operand.vmem [shape: bf16[256,768], index: 7, kind: input, shape index: {}]   ;;  %s4394_s8 = inlined_call_operand.vmem [shape: f32[1,768], index: 8, kind: input, shape index: {}]   ;;  %s4395_s9 = inlined_call_operand.hbm [shape: bf16[512,768], index: 9, kind: output, shape index: {}]  }
   0x1   :  { %16 = vsyncpa [#allocation3 + $0x1], 0  ;;  %s3388_s30 = smov 0   ;;  %s3390_s10 = smov 0  }
   0x2   :  { %s3392_s11 = smov 0   ;;  %s3394_s12 = smov 0  }
   0x3 LB: > { %s3409_s13 = sadd.s32 4294967295, %s3332_s12   ;;  %s2671_s14 = sadd.s32 4294967294, %s3332_s12   ;;  %s3332_s12 = sphi %s3394_s12, %s4401_s12   ;;  %s3328_s11 = sphi %s3392_s11, %s4400_s11   ;;  %s3324_s10 = sphi %s3390_s10, %s4399_s10   ;;  %s3320_s30 = sphi %s3388_s30, %s4398_s30  }
   0x4   : > { %s3413_s15 = sadd.s32 1, %s3332_s12   ;;  %s223_s16 = sadd.s32 1, %s3328_s11 }
   0x5   : > { %s220_s17 = ssub.s32 %s3332_s12, %s3413_s15  ;;  %p233_p0 = scmp.ne.s32.totalorder %s3328_s11, %s3324_s10 }
   0x6   : > { %p221_p1 = scmp.eq.s32.totalorder %s220_s17, 0  ;;  %p234_p2 = scmp.eq.s32.totalorder %s3409_s13, 3 }
   0x7   : > { %p239_p3 = scmp.ne.s32.totalorder %s3324_s10, %s3320_s30  ;;  %p240_p4 = scmp.eq.s32.totalorder %s2671_s14, 3 }
   0x8   : > { %s3424_s18 = scalar_select %p221_p1, %s3328_s11, %s223_s16  }
   0x9   : > { %p3426_p5 = por %p234_p2, %p233_p0  ;;  %p3430_p6 = por %p240_p4, %p239_p3 }
   0xa   : > { %p2674_p7 = scmp.ge.s32.totalorder %s3332_s12, 1  ;;  %p291_p8 = scmp.lt.s32.totalorder %s3332_s12, 5 }
   0xc   : > { %p292_p9 = pnand %p2674_p7, %p291_p8 }
   0xd   : > { %s2675_s23 = sshll.u32 (!%p292_p9), %s3409_s13, 4  ;;  %s2983_s21 = smul.u32 (!%p292_p9), 6144, %s3409_s13 }
   0xe   : > { %295 = sbr.rel (%p292_p9) target bundleno = 959 (0x3bf), region = 56  ;;  %p328_p10 = scmp.lt.s32.totalorder (!%p292_p9), %s2675_s23, 63 }
   0xf   : > { %s3335_s27 = smov (!%p292_p9), [#allocation2]  }
  0x10   : > { %s3276_s29 = sshll.u32 (!%p292_p9), %s3335_s27, 4  ;;  %s3277_s29 = int_to_ptr.vmem [resolvable:$false] %s3276_s29 }
  0x11   : > { %s3278_s14 = scalar_lea.vmem (!%p292_p9), %s3277_s29, 12288 }
  0x13   : > { %v3026_v0 = vld [vmem:[%s4387_s1 + $0x14] ss:$8 sps:$4 sm:$0xff]   ;;  %v3028_v1 = vld [vmem:[%s4387_s1 + $0x10] ss:$8 sps:$4 sm:$0xff]   ;;  %v3334_v2 = vmov 0   ;;  %s4403_s23 = smov (!%p328_p10, %s2675_s23), 63 }
  0x14   : > { %452 = vmatprep.mubr.bf16.mxu0 %v3334_v2  ;;  %432 = vmatprep.subr.bf16.mxu0 %v3026_v0  ;;  %v3029_v3 = vld [vmem:[%s4387_s1 + $0x4] ss:$8 sps:$4 sm:$0xff]   ;;  %v3031_v4 = vld [vmem:[%s4387_s1] ss:$8 sps:$4 sm:$0xff]   ;;  %v3032_v5 = vld [vmem:[%s4389_s3 + $0x74] ss:$8 sps:$4 sm:$0xff]  }
  0x15   : > { %433 = vmatpush1.bf16.msra.mxu0 %v3028_v1  ;;  %v3034_v6 = vld [vmem:[%s4389_s3 + $0x70] ss:$8 sps:$4 sm:$0xff]   ;;  %v3035_v7 = vld [vmem:[%s4389_s3 + $0x64] ss:$8 sps:$4 sm:$0xff]   ;;  %s2676_s25 = sshll.u32 %s4403_s23, 3  ;;  %785 = vmatprep.subr.bf16.mxu1 %v3032_v5  ;;  %vm395_vm0 = vcmask 261120  }
  0x16   : > { %434 = vmatprep.subr.bf16.mxu0 %v3029_v3  ;;  %s3462_s28 = scalar_lea.vmem %s4386_s0, %s2676_s25  ;;  %786 = vmatpush1.bf16.msra.mxu1 %v3034_v6  ;;  %v3037_v8 = vld [vmem:[%s4389_s3 + $0x60] ss:$8 sps:$4 sm:$0xff]   ;;  %v3038_v11 = vld [vmem:[%s4389_s3 + $0x54] ss:$8 sps:$4 sm:$0xff]   ;;  %v3040_v13 = vld [vmem:[%s4389_s3 + $0x50] ss:$8 sps:$4 sm:$0xff]   ;;  %s4339_s25 = scalar_lea.hbm %s4395_s9, %s2983_s21 }
  0x17   : > { %v335_v9 = vld [vmem:[%s3462_s28] sm:$0xff]  ;;  %v336_v10 = vld [vmem:[%s3462_s28 + $0x8] sm:$0xff]  ;;  %787 = vmatprep.subr.bf16.mxu1 %v3035_v7  ;;  %v337_v14 = vld [vmem:[%s3462_s28 + $0x10] sm:$0xff]  ;;  %s324_s23 = sand.u32 1, %s3324_s10  }
  0x18   : > { %v351_v12 = vpack.c.bf16 %v336_v10, %v335_v9  ;;  %v338_v15 = vld [vmem:[%s3462_s28 + $0x18] sm:$0xff]  ;;  %v3041_v16 = vld [vmem:[%s4389_s3 + $0x44] ss:$8 sps:$4 sm:$0xff]   ;;  %v3043_v18 = vld [vmem:[%s4389_s3 + $0x40] ss:$8 sps:$4 sm:$0xff]   ;;  %s2982_s16 = smul.u32 384, %s324_s23 }
  0x19   : > { %435 = vmatpush1.bf16.msra.mxu0 %v3031_v4  ;;  %v352_v17 = vpack.c.bf16 %v338_v15, %v337_v14  ;;  %v3044_v19 = vld [vmem:[%s4389_s3 + $0x34] ss:$8 sps:$4 sm:$0xff]   ;;  %v339_v20 = vld [vmem:[%s3462_s28 + $0x20] sm:$0xff]  ;;  %v3046_v21 = vld [vmem:[%s4389_s3 + $0x30] ss:$8 sps:$4 sm:$0xff]   ;;  %s4346_s13 = scalar_lea.sflag [#allocation3], %s324_s23 }
  0x1a   : > { %788 = vmatpush1.bf16.msra.mxu1 %v3037_v8  ;;  %v340_v22 = vld [vmem:[%s3462_s28 + $0x28] sm:$0xff]  ;;  %v3050_v26 = vld [vmem:[%s4389_s3 + $0x14] ss:$8 sps:$4 sm:$0xff]   ;;  %v3052_v29 = vld [vmem:[%s4389_s3 + $0x10] ss:$8 sps:$4 sm:$0xff]   ;;  %s4185_s17 = scalar_lea.vmem [#allocation2], %s2982_s16 }
  0x1b   : > { %789 = vmatprep.subr.bf16.mxu1 %v3038_v11  ;;  %v3047_v23 = vld [vmem:[%s4389_s3 + $0x24] ss:$8 sps:$4 sm:$0xff]   ;;  %v353_v24 = vpack.c.bf16 %v340_v22, %v339_v20  ;;  %v3049_v25 = vld [vmem:[%s4389_s3 + $0x20] ss:$8 sps:$4 sm:$0xff]   ;;  %v341_v27 = vld [vmem:[%s3462_s28 + $0x30] sm:$0xff]  ;;  %s2609_s22 = sshll.u32 %s4185_s17, 4  ;;  %s4341_s22 = int_to_ptr.vmem [resolvable:$true] %s2609_s22 }
  0x1c   : > { %2681 = vmatmul.mubr.msk.bf16.vlgmr.msra.gmra.mxu0 %vm395_vm0, %v351_v12  ;;  %v342_v28 = vld [vmem:[%s3462_s28 + $0x38] sm:$0xff]  ;;  %v3053_v30 = vld [vmem:[%s4389_s3 + $0x4] ss:$8 sps:$4 sm:$0xff]   ;;  %v3055_v31 = vld [vmem:[%s4389_s3] ss:$8 sps:$4 sm:$0xff]   ;;  %s3272_s26 = scalar_lea.vmem %s4341_s22, 6144  ;;  %p3279_p0 = scmp.lt.s32.totalorder %s4341_s22, %s3277_s29 }
  0x1d   : > { %462 = vmatprep.mubr.bf16.mxu0 %v3334_v2  ;;  %v3056_v32 = vld [vmem:[%s4389_s3 + $0xf4] ss:$8 sps:$4 sm:$0xff]   ;;  %v354_v33 = vpack.c.bf16 %v342_v28, %v341_v27  ;;  %v3058_v34 = vld [vmem:[%s4389_s3 + $0xf0] ss:$8 sps:$4 sm:$0xff]   ;;  %v343_v35 = vld [vmem:[%s3462_s28 + $0x40] sm:$0xff]  ;;  %p3273_p11 = scmp.ne.s32.totalorder %s4341_s22, %s3272_s26  ;;  %p3280_p1 = scmp.lt.s32.totalorder %s3278_s14, %s3272_s26 }
  0x1e   : > { %790 = vmatpush1.bf16.msra.mxu1 %v3040_v13  ;;  %v344_v36 = vld [vmem:[%s3462_s28 + $0x48] sm:$0xff]  ;;  %v3062_v39 = vld [vmem:[%s4389_s3 + $0xd4] ss:$8 sps:$4 sm:$0xff]   ;;  %v3064_v41 = vld [vmem:[%s4389_s3 + $0xd0] ss:$8 sps:$4 sm:$0xff]  }
  0x1f   : > { %791 = vmatprep.subr.bf16.mxu1 %v3041_v16  ;;  %v3059_v37 = vld [vmem:[%s4389_s3 + $0xe4] ss:$8 sps:$4 sm:$0xff]   ;;  %v3061_v38 = vld [vmem:[%s4389_s3 + $0xe0] ss:$8 sps:$4 sm:$0xff]   ;;  %v355_v40 = vpack.c.bf16 %v344_v36, %v343_v35  ;;  %v345_v42 = vld [vmem:[%s3462_s28 + $0x50] sm:$0xff]  ;;  %p3274_p12 = pnand %p3273_p11, %p3426_p5  ;;  %p3281_p2 = por %p3280_p1, %p3279_p0 }
  0x20   : > { %v346_v43 = vld [vmem:[%s3462_s28 + $0x58] sm:$0xff]  ;;  %v3065_v44 = vld [vmem:[%s4389_s3 + $0xc4] ss:$8 sps:$4 sm:$0xff]   ;;  %v3067_v45 = vld [vmem:[%s4389_s3 + $0xc0] ss:$8 sps:$4 sm:$0xff]  }
  0x21   : > { %v3068_v46 = vld [vmem:[%s4389_s3 + $0xb4] ss:$8 sps:$4 sm:$0xff]   ;;  %v356_v47 = vpack.c.bf16 %v346_v43, %v345_v42  ;;  %v3070_v48 = vld [vmem:[%s4389_s3 + $0xb0] ss:$8 sps:$4 sm:$0xff]   ;;  %v347_v49 = vld [vmem:[%s3462_s28 + $0x60] sm:$0xff]  ;;  %p3275_p13 = pneg %p3274_p12 }
  0x22   : > { %792 = vmatpush1.bf16.msra.mxu1 %v3043_v18  ;;  %v348_v50 = vld [vmem:[%s3462_s28 + $0x68] sm:$0xff]  ;;  %v349_v52 = vld [vmem:[%s3462_s28 + $0x70] sm:$0xff]  ;;  %v350_v53 = vld [vmem:[%s3462_s28 + $0x78] sm:$0xff] }
  0x23   : > { %793 = vmatprep.subr.bf16.mxu1 %v3044_v19  ;;  %v357_v51 = vpack.c.bf16 %v348_v50, %v347_v49  ;;  %v358_v54 = vpack.c.bf16 %v350_v53, %v349_v52  ;;  %v3071_v55 = vld [vmem:[%s4389_s3 + $0xa4] ss:$8 sps:$4 sm:$0xff]   ;;  %v3073_v56 = vld [vmem:[%s4389_s3 + $0xa0] ss:$8 sps:$4 sm:$0xff]   ;;  %v3074_v57 = vld [vmem:[%s4389_s3 + $0x94] ss:$8 sps:$4 sm:$0xff]   ;;  %p3282_p3 = pnand %p3281_p2, %p3275_p13 }
  0x24   : > { %2682 = vmatmul.mubr.msk.bf16.gmra.mxu0 %vm395_vm0, %v352_v17  ;;  %v3076_v58 = vld [vmem:[%s4389_s3 + $0x90] ss:$8 sps:$4 sm:$0xff]   ;;  %v3077_v59 = vld [vmem:[%s4389_s3 + $0x84] ss:$8 sps:$4 sm:$0xff]   ;;  %v3079_v60 = vld [vmem:[%s4389_s3 + $0x80] ss:$8 sps:$4 sm:$0xff]  }
  0x25   : > { %472 = vmatprep.mubr.bf16.mxu0 %v3334_v2  ;;  %v3080_v61 = vld [vmem:[%s4391_s5 + $0x70] ss:$8 sps:$4 sm:$0xff]   ;;  %v3082_v62 = vld [vmem:[%s4391_s5 + $0x74] ss:$8 sps:$4 sm:$0xff]   ;;  %v3085_v63 = vld [vmem:[%s4391_s5 + $0x64] ss:$8 sps:$4 sm:$0xff]  }
  0x26   : > { %794 = vmatpush1.bf16.msra.mxu1 %v3046_v21  ;;  %1150 = vmatprep.subr.bf16.mxu0 %v3082_v62  ;;  %v3083_v0 = vld [vmem:[%s4391_s5 + $0x60] ss:$8 sps:$4 sm:$0xff]   ;;  %v3088_v1 = vld [vmem:[%s4391_s5 + $0x54] ss:$8 sps:$4 sm:$0xff]   ;;  %v3091_v3 = vld [vmem:[%s4391_s5 + $0x44] ss:$8 sps:$4 sm:$0xff]  }
  0x27   : > { %795 = vmatprep.subr.bf16.mxu1 %v3047_v23  ;;  %1151 = vmatpush1.bf16.msra.mxu0 %v3080_v61  ;;  %v3089_v4 = vld [vmem:[%s4391_s5 + $0x40] ss:$8 sps:$4 sm:$0xff]   ;;  %v3094_v5 = vld [vmem:[%s4391_s5 + $0x34] ss:$8 sps:$4 sm:$0xff]   ;;  %v3092_v6 = vld [vmem:[%s4391_s5 + $0x30] ss:$8 sps:$4 sm:$0xff]   ;;  %v365_v23 = vlaneseq }
  0x28   : > { %1152 = vmatprep.subr.bf16.mxu0 %v3085_v63  ;;  %v3097_v7 = vld [vmem:[%s4391_s5 + $0x24] ss:$8 sps:$4 sm:$0xff]   ;;  %v3095_v8 = vld [vmem:[%s4391_s5 + $0x20] ss:$8 sps:$4 sm:$0xff]   ;;  %v3100_v9 = vld [vmem:[%s4391_s5 + $0x14] ss:$8 sps:$4 sm:$0xff]  }
  0x29   : > { %v3098_v10 = vld [vmem:[%s4391_s5 + $0x10] ss:$8 sps:$4 sm:$0xff]   ;;  %v3103_v11 = vld [vmem:[%s4391_s5 + $0x4] ss:$8 sps:$4 sm:$0xff]   ;;  %v3101_v12 = vld [vmem:[%s4391_s5] ss:$8 sps:$4 sm:$0xff]  }
  0x2a   : > { %796 = vmatpush1.bf16.msra.mxu1 %v3049_v25  ;;  %v3106_v13 = vld [vmem:[%s4391_s5 + $0xf4] ss:$8 sps:$4 sm:$0xff]   ;;  %v3104_v14 = vld [vmem:[%s4391_s5 + $0xf0] ss:$8 sps:$4 sm:$0xff]   ;;  %v3109_v15 = vld [vmem:[%s4391_s5 + $0xe4] ss:$8 sps:$4 sm:$0xff]  }
  0x2b   : > { %797 = vmatprep.subr.bf16.mxu1 %v3050_v26  ;;  %1153 = vmatpush1.bf16.msra.mxu0 %v3083_v0  ;;  %v3107_v16 = vld [vmem:[%s4391_s5 + $0xe0] ss:$8 sps:$4 sm:$0xff]   ;;  %v3112_v17 = vld [vmem:[%s4391_s5 + $0xd4] ss:$8 sps:$4 sm:$0xff]   ;;  %v3110_v18 = vld [vmem:[%s4391_s5 + $0xd0] ss:$8 sps:$4 sm:$0xff]  }
  0x2c   : > { %2683 = vmatmul.mubr.msk.bf16.gmra.mxu0 %vm395_vm0, %v353_v24  ;;  %1154 = vmatprep.subr.bf16.mxu0 %v3088_v1  ;;  %v3115_v19 = vld [vmem:[%s4391_s5 + $0xc4] ss:$8 sps:$4 sm:$0xff]   ;;  %v3113_v20 = vld [vmem:[%s4391_s5 + $0xc0] ss:$8 sps:$4 sm:$0xff]   ;;  %v3118_v21 = vld [vmem:[%s4391_s5 + $0xb4] ss:$8 sps:$4 sm:$0xff]  }
  0x2d   : > { %482 = vmatprep.mubr.bf16.mxu0 %v3334_v2  ;;  %v3116_v22 = vld [vmem:[%s4391_s5 + $0xb0] ss:$8 sps:$4 sm:$0xff]   ;;  %v3660_v24 = vshrl.u32 %v365_v23, 7  ;;  %v363_v27 = vld [vmem:[%s4388_s2] sm:$0x3] }
  0x2e   : > { %798 = vmatpush1.bf16.msra.mxu1 %v3052_v29 }
  0x2f   : > { %799 = vmatprep.subr.bf16.mxu1 %v3053_v30  ;;  %v3663_v25 = vsub.s32 1, %v3660_v24  ;;  %v3666_v26 = vsub.s32 0, %v3660_v24 }
  0x31   : > { %v3672_v29 = vrot.slane %v363_v27, %v3663_v25  ;;  %v3675_v30 = vrot.slane %v363_v27, %v3666_v26 }
  0x32   : > { %800 = vmatpush1.bf16.msra.mxu1 %v3055_v31 }
  0x33   : > { %801 = vmatprep.subr.bf16.mxu1 %v3056_v32 }
  0x34   : > { %2684 = vmatmul.mubr.msk.bf16.gmra.mxu0 %vm395_vm0, %v354_v33 }
  0x35   : > { %492 = vmatprep.mubr.bf16.mxu0 %v3334_v2 }
  0x36   : > { %802 = vmatpush2.bf16.msra.mxu1 %v3058_v34 }
  0x37   : > { %803 = vmatprep.subr.bf16.mxu1 %v3059_v37 }
  0x3a   : > { %804 = vmatpush2.bf16.msra.mxu1 %v3061_v38 }
  0x3b   : > { %805 = vmatprep.subr.bf16.mxu1 %v3062_v39 }
  0x3c   : > { %2685 = vmatmul.mubr.msk.bf16.gmra.mxu0 %vm395_vm0, %v355_v40 }
  0x3d   : > { %502 = vmatprep.mubr.bf16.mxu0 %v3334_v2 }
  0x3e   : > { %806 = vmatpush2.bf16.msra.mxu1 %v3064_v41 }
  0x3f   : > { %807 = vmatprep.subr.bf16.mxu1 %v3065_v44 }
  0x42   : > { %808 = vmatpush2.bf16.msra.mxu1 %v3067_v45 }
  0x43   : > { %809 = vmatprep.subr.bf16.mxu1 %v3068_v46 }
  0x44   : > { %2686 = vmatmul.mubr.msk.bf16.gmra.mxu0 %vm395_vm0, %v356_v47 }
  0x45   : > { %512 = vmatprep.mubr.bf16.mxu0 %v3334_v2 }
  0x46   : > { %810 = vmatpush2.bf16.msra.mxu1 %v3070_v48 }
  0x47   : > { %811 = vmatprep.subr.bf16.mxu1 %v3071_v55 }
  0x4a   : > { %812 = vmatpush2.bf16.msra.mxu1 %v3073_v56 }
  0x4b   : > { %813 = vmatprep.subr.bf16.mxu1 %v3074_v57 }
  0x4c   : > { %2687 = vmatmul.mubr.msk.bf16.gmra.mxu0 %vm395_vm0, %v357_v51 }
  0x4d   : > { %522 = vmatprep.mubr.bf16.mxu0 %v3334_v2  ;;  %v3086_v2 = vld [vmem:[%s4391_s5 + $0x50] ss:$8 sps:$4 sm:$0xff]  }
  0x4e   : > { %814 = vmatpush2.bf16.msra.mxu1 %v3076_v58  ;;  %1155 = vmatpush1.bf16.msra.mxu0 %v3086_v2 }
  0x4f   : > { %815 = vmatprep.subr.bf16.mxu1 %v3077_v59  ;;  %1156 = vmatprep.subr.bf16.mxu0 %v3091_v3 }
  0x52   : > { %816 = vmatpush2.bf16.msra.mxu1 %v3079_v60  ;;  %1157 = vmatpush1.bf16.msra.mxu0 %v3089_v4 }
  0x53   : > { %1158 = vmatprep.subr.bf16.mxu0 %v3094_v5 }
  0x54   : > { %2688 = vmatmul.mubr.msk.bf16.gmra.mxu0 %vm395_vm0, %v358_v54 }
  0x56   : > { %1159 = vmatpush1.bf16.msra.mxu0 %v3092_v6 }
  0x57   : > { %1160 = vmatprep.subr.bf16.mxu0 %v3097_v7 }
  0x5a   : > { %1161 = vmatpush1.bf16.msra.mxu0 %v3095_v8 }
  0x5b   : > { %1162 = vmatprep.subr.bf16.mxu0 %v3100_v9 }
  0x5e   : > { %1163 = vmatpush1.bf16.msra.mxu0 %v3098_v10 }
  0x5f   : > { %1164 = vmatprep.subr.bf16.mxu0 %v3103_v11 }
  0x62   : > { %1165 = vmatpush1.bf16.msra.mxu0 %v3101_v12 }
  0x63   : > { %1166 = vmatprep.subr.bf16.mxu0 %v3106_v13 }
  0x66   : > { %1167 = vmatpush2.bf16.msra.mxu0 %v3104_v14 }
  0x67   : > { %1168 = vmatprep.subr.bf16.mxu0 %v3109_v15 }
  0x6a   : > { %1169 = vmatpush2.bf16.msra.mxu0 %v3107_v16 }
  0x6b   : > { %1170 = vmatprep.subr.bf16.mxu0 %v3112_v17 }
  0x6e   : > { %1171 = vmatpush2.bf16.msra.mxu0 %v3110_v18 }
  0x6f   : > { %1172 = vmatprep.subr.bf16.mxu0 %v3115_v19 }
  0x72   : > { %1173 = vmatpush2.bf16.msra.mxu0 %v3113_v20 }
  0x73   : > { %1174 = vmatprep.subr.bf16.mxu0 %v3118_v21 }
  0x76   : > { %1175 = vmatpush2.bf16.msra.mxu0 %v3116_v22 }
  0xdc   : > { %v454_v28 = vpop.f32.mrf.mxu0 }
  0xdd   : > { %v455_v35 = vadd.f32 %v454_v28, %v3675_v30 }
  0xde   : > { %v456_v31 = vpop.f32.mrf.mxu0 }
  0xdf   : > { %v457_v33 = vadd.f32 %v456_v31, %v3672_v29  ;;  %v533_v42 = vmax.f32 %v455_v35, 0.0 }
  0xe0   : > { %v458_v32 = vpop.f32.mrf.mxu0 }
  0xe1   : > { %v459_v34 = vadd.f32 %v458_v32, %v3675_v30  ;;  %v534_v40 = vmax.f32 %v457_v33, 0.0 }
  0xe2   : > { %v460_v36 = vpop.f32.mrf.mxu0 }
  0xe3   : > { %v461_v37 = vadd.f32 %v460_v36, %v3672_v29  ;;  %v535_v38 = vmax.f32 %v459_v34, 0.0 }
  0xe4   : > { %v464_v39 = vpop.f32.mrf.mxu0 }
  0xe5   : > { %v536_v41 = vmax.f32 %v461_v37, 0.0  ;;  %v565_v45 = vpack.c.bf16 %v535_v38, %v533_v42  ;;  %v465_v49 = vadd.f32 %v464_v39, %v3675_v30 }
  0xe6   : > { %v466_v43 = vpop.f32.mrf.mxu0 }
  0xe7   : > { %v566_v44 = vpack.c.bf16 %v536_v41, %v534_v40  ;;  %v467_v47 = vadd.f32 %v466_v43, %v3672_v29  ;;  %v537_v56 = vmax.f32 %v465_v49, 0.0 }
  0xe8   : > { %v468_v46 = vpop.f32.mrf.mxu0 }
  0xe9   : > { %v469_v48 = vadd.f32 %v468_v46, %v3675_v30  ;;  %817 = vmatprep.mubr.bf16.mxu1 %v566_v44  ;;  %v538_v54 = vmax.f32 %v467_v47, 0.0 }
  0xea   : > { %v470_v50 = vpop.f32.mrf.mxu0  ;;  %818 = vmatmul.mubr.bf16.vlgmr.msra.gmra.mxu1 %v565_v45 }
  0xeb   : > { %v471_v51 = vadd.f32 %v470_v50, %v3672_v29  ;;  %v539_v52 = vmax.f32 %v469_v48, 0.0 }
  0xec   : > { %v474_v53 = vpop.f32.mrf.mxu0 }
  0xed   : > { %v540_v55 = vmax.f32 %v471_v51, 0.0  ;;  %v567_v59 = vpack.c.bf16 %v539_v52, %v537_v56  ;;  %v475_v63 = vadd.f32 %v474_v53, %v3675_v30 }
  0xee   : > { %v476_v57 = vpop.f32.mrf.mxu0 }
  0xef   : > { %v568_v58 = vpack.c.bf16 %v540_v55, %v538_v54  ;;  %v477_v61 = vadd.f32 %v476_v57, %v3672_v29  ;;  %v541_v6 = vmax.f32 %v475_v63, 0.0 }
  0xf0   : > { %v478_v60 = vpop.f32.mrf.mxu0 }
  0xf1   : > { %v479_v62 = vadd.f32 %v478_v60, %v3675_v30  ;;  %827 = vmatprep.mubr.bf16.mxu1 %v568_v58  ;;  %v542_v4 = vmax.f32 %v477_v61, 0.0 }
  0xf2   : > { %v480_v0 = vpop.f32.mrf.mxu0  ;;  %828 = vmatmul.mubr.bf16.gmra.mxu1 %v567_v59 }
  0xf3   : > { %v481_v1 = vadd.f32 %v480_v0, %v3672_v29  ;;  %v543_v2 = vmax.f32 %v479_v62, 0.0 }
  0xf4   : > { %v484_v3 = vpop.f32.mrf.mxu0 }
  0xf5   : > { %v544_v5 = vmax.f32 %v481_v1, 0.0  ;;  %v569_v9 = vpack.c.bf16 %v543_v2, %v541_v6  ;;  %v485_v13 = vadd.f32 %v484_v3, %v3675_v30 }
  0xf6   : > { %v486_v7 = vpop.f32.mrf.mxu0 }
  0xf7   : > { %v570_v8 = vpack.c.bf16 %v544_v5, %v542_v4  ;;  %v487_v11 = vadd.f32 %v486_v7, %v3672_v29  ;;  %v545_v20 = vmax.f32 %v485_v13, 0.0 }
  0xf8   : > { %v488_v10 = vpop.f32.mrf.mxu0 }
  0xf9   : > { %v489_v12 = vadd.f32 %v488_v10, %v3675_v30  ;;  %837 = vmatprep.mubr.bf16.mxu1 %v570_v8  ;;  %v546_v18 = vmax.f32 %v487_v11, 0.0 }
  0xfa   : > { %v490_v14 = vpop.f32.mrf.mxu0  ;;  %838 = vmatmul.mubr.bf16.gmra.mxu1 %v569_v9 }
  0xfb   : > { %v491_v15 = vadd.f32 %v490_v14, %v3672_v29  ;;  %v547_v16 = vmax.f32 %v489_v12, 0.0 }
  0xfc   : > { %v494_v17 = vpop.f32.mrf.mxu0 }
  0xfd   : > { %v548_v19 = vmax.f32 %v491_v15, 0.0  ;;  %v571_v23 = vpack.c.bf16 %v547_v16, %v545_v20  ;;  %v495_v32 = vadd.f32 %v494_v17, %v3675_v30  ;;  %v3122_v20 = vld [vmem:[%s4391_s5 + $0x90] ss:$8 sps:$4 sm:$0xff]  }
  0xfe   : > { %v496_v21 = vpop.f32.mrf.mxu0 }
  0xff   : > { %v572_v22 = vpack.c.bf16 %v548_v19, %v546_v18  ;;  %v497_v28 = vadd.f32 %v496_v21, %v3672_v29  ;;  %v549_v39 = vmax.f32 %v495_v32, 0.0  ;;  %v3121_v19 = vld [vmem:[%s4391_s5 + $0xa4] ss:$8 sps:$4 sm:$0xff]   ;;  %v3134_v32 = vld [vmem:[%s4393_s7 + $0x120] ss:$24 sps:$4 sm:$0xff]  }
 0x100   : > { %v498_v27 = vpop.f32.mrf.mxu0  ;;  %1176 = vmatprep.subr.bf16.mxu0 %v3121_v19  ;;  %v3127_v21 = vld [vmem:[%s4391_s5 + $0x84] ss:$8 sps:$4 sm:$0xff]  }
 0x101   : > { %v499_v31 = vadd.f32 %v498_v27, %v3675_v30  ;;  %847 = vmatprep.mubr.bf16.mxu1 %v572_v22  ;;  %v550_v37 = vmax.f32 %v497_v28, 0.0  ;;  %v3125_v22 = vld [vmem:[%s4391_s5 + $0x80] ss:$8 sps:$4 sm:$0xff]   ;;  %v3130_v27 = vld [vmem:[%s4393_s7 + $0x154] ss:$24 sps:$4 sm:$0xff]  }
 0x102   : > { %v500_v33 = vpop.f32.mrf.mxu0  ;;  %848 = vmatmul.mubr.bf16.gmra.mxu1 %v571_v23  ;;  %v3128_v23 = vld [vmem:[%s4393_s7 + $0x150] ss:$24 sps:$4 sm:$0xff]   ;;  %v3133_v28 = vld [vmem:[%s4393_s7 + $0x15c] ss:$24 sps:$4 sm:$0xff]   ;;  %1919 = vmatprep.subr.bf16.mxu1 %v3130_v27 }
 0x103   : > { %v501_v34 = vadd.f32 %v500_v33, %v3672_v29  ;;  %v551_v35 = vmax.f32 %v499_v31, 0.0  ;;  %v3136_v31 = vld [vmem:[%s4393_s7 + $0x124] ss:$24 sps:$4 sm:$0xff]   ;;  %1920 = vmatpush1.bf16.msra.mxu1 %v3128_v23  ;;  %v3142_v33 = vld [vmem:[%s4393_s7 + $0xf4] ss:$24 sps:$4 sm:$0xff]  }
 0x104   : > { %v504_v36 = vpop.f32.mrf.mxu0  ;;  %1921 = vmatprep.subr.bf16.mxu1 %v3136_v31 }
 0x105   : > { %v552_v38 = vmax.f32 %v501_v34, 0.0  ;;  %v573_v42 = vpack.c.bf16 %v551_v35, %v549_v39  ;;  %v505_v46 = vadd.f32 %v504_v36, %v3675_v30  ;;  %v3140_v34 = vld [vmem:[%s4393_s7 + $0xf0] ss:$24 sps:$4 sm:$0xff]   ;;  %v3148_v35 = vld [vmem:[%s4393_s7 + $0xc4] ss:$24 sps:$4 sm:$0xff]  }
 0x106   : > { %v506_v40 = vpop.f32.mrf.mxu0  ;;  %v3146_v36 = vld [vmem:[%s4393_s7 + $0xc0] ss:$24 sps:$4 sm:$0xff]   ;;  %v3160_v39 = vld [vmem:[%s4393_s7 + $0x64] ss:$24 sps:$4 sm:$0xff]  }
 0x107   : > { %v574_v41 = vpack.c.bf16 %v552_v38, %v550_v37  ;;  %v507_v44 = vadd.f32 %v506_v40, %v3672_v29  ;;  %v553_v53 = vmax.f32 %v505_v46, 0.0  ;;  %1922 = vmatpush1.bf16.msra.mxu1 %v3134_v32  ;;  %v3154_v37 = vld [vmem:[%s4393_s7 + $0x94] ss:$24 sps:$4 sm:$0xff]   ;;  %v3152_v38 = vld [vmem:[%s4393_s7 + $0x90] ss:$24 sps:$4 sm:$0xff]  }
 0x108   : > { %v508_v43 = vpop.f32.mrf.mxu0  ;;  %1923 = vmatprep.subr.bf16.mxu1 %v3142_v33  ;;  %v3158_v40 = vld [vmem:[%s4393_s7 + $0x60] ss:$24 sps:$4 sm:$0xff]   ;;  %v3176_v46 = vld [vmem:[%s4393_s7 + $0x2d0] ss:$24 sps:$4 sm:$0xff]   ;;  %v3151_v33 = vld [vmem:[%s4393_s7 + $0xcc] ss:$24 sps:$4 sm:$0xff]  }
 0x109   : > { %v509_v45 = vadd.f32 %v508_v43, %v3675_v30  ;;  %857 = vmatprep.mubr.bf16.mxu1 %v574_v41  ;;  %v554_v51 = vmax.f32 %v507_v44, 0.0  ;;  %v3166_v41 = vld [vmem:[%s4393_s7 + $0x34] ss:$24 sps:$4 sm:$0xff]   ;;  %v3172_v43 = vld [vmem:[%s4393_s7 + $0x4] ss:$24 sps:$4 sm:$0xff]  }
 0x10a   : > { %v510_v47 = vpop.f32.mrf.mxu0  ;;  %858 = vmatmul.mubr.bf16.gmra.mxu1 %v573_v42  ;;  %v3164_v42 = vld [vmem:[%s4393_s7 + $0x30] ss:$24 sps:$4 sm:$0xff]   ;;  %v3170_v44 = vld [vmem:[%s4393_s7] ss:$24 sps:$4 sm:$0xff]  }
 0x10b   : > { %v511_v48 = vadd.f32 %v510_v47, %v3672_v29  ;;  %v555_v49 = vmax.f32 %v509_v45, 0.0  ;;  %1924 = vmatpush1.bf16.msra.mxu1 %v3140_v34  ;;  %v3178_v45 = vld [vmem:[%s4393_s7 + $0x2d4] ss:$24 sps:$4 sm:$0xff]   ;;  %v3184_v47 = vld [vmem:[%s4393_s7 + $0x2a4] ss:$24 sps:$4 sm:$0xff]  }
 0x10c   : > { %v514_v50 = vpop.f32.mrf.mxu0  ;;  %1925 = vmatprep.subr.bf16.mxu1 %v3148_v35 }
 0x10d   : > { %v556_v52 = vmax.f32 %v511_v48, 0.0  ;;  %v575_v56 = vpack.c.bf16 %v555_v49, %v553_v53  ;;  %v515_v60 = vadd.f32 %v514_v50, %v3675_v30  ;;  %v3182_v48 = vld [vmem:[%s4393_s7 + $0x2a0] ss:$24 sps:$4 sm:$0xff]   ;;  %v3190_v49 = vld [vmem:[%s4393_s7 + $0x274] ss:$24 sps:$4 sm:$0xff]  }
 0x10e   : > { %v516_v54 = vpop.f32.mrf.mxu0  ;;  %v3188_v50 = vld [vmem:[%s4393_s7 + $0x270] ss:$24 sps:$4 sm:$0xff]   ;;  %v3202_v53 = vld [vmem:[%s4393_s7 + $0x214] ss:$24 sps:$4 sm:$0xff]  }
 0x10f   : > { %v576_v55 = vpack.c.bf16 %v556_v52, %v554_v51  ;;  %v517_v58 = vadd.f32 %v516_v54, %v3672_v29  ;;  %v557_v3 = vmax.f32 %v515_v60, 0.0  ;;  %1926 = vmatpush1.bf16.msra.mxu1 %v3146_v36  ;;  %v3196_v51 = vld [vmem:[%s4393_s7 + $0x244] ss:$24 sps:$4 sm:$0xff]   ;;  %v3194_v52 = vld [vmem:[%s4393_s7 + $0x240] ss:$24 sps:$4 sm:$0xff]  }
 0x110   : > { %v518_v57 = vpop.f32.mrf.mxu0  ;;  %1927 = vmatprep.subr.bf16.mxu1 %v3154_v37  ;;  %v3200_v54 = vld [vmem:[%s4393_s7 + $0x210] ss:$24 sps:$4 sm:$0xff]  }
 0x111   : > { %v519_v59 = vadd.f32 %v518_v57, %v3675_v30  ;;  %867 = vmatprep.mubr.bf16.mxu1 %v576_v55  ;;  %v558_v1 = vmax.f32 %v517_v58, 0.0  ;;  %v613_v55 = vld [vmem:[%s4390_s4] sm:$0x3] }
 0x112   : > { %v520_v61 = vpop.f32.mrf.mxu0  ;;  %868 = vmatmul.mubr.bf16.gmra.mxu1 %v575_v56  ;;  %v3812_v57 = vrot.slane %v613_v55, %v3663_v25  ;;  %v3815_v58 = vrot.slane %v613_v55, %v3666_v26 }
 0x113   : > { %v521_v62 = vadd.f32 %v520_v61, %v3672_v29  ;;  %v559_v63 = vmax.f32 %v519_v59, 0.0  ;;  %1928 = vmatpush1.bf16.msra.mxu1 %v3152_v38 }
 0x114   : > { %v524_v0 = vpop.f32.mrf.mxu0  ;;  %1929 = vmatprep.subr.bf16.mxu1 %v3160_v39  ;;  %v3149_v39 = vld [vmem:[%s4393_s7 + $0xc8] ss:$24 sps:$4 sm:$0xff]  }
 0x115   : > { %v560_v2 = vmax.f32 %v521_v62, 0.0  ;;  %v577_v6 = vpack.c.bf16 %v559_v63, %v557_v3  ;;  %v525_v10 = vadd.f32 %v524_v0, %v3675_v30 }
 0x116   : > { %v526_v4 = vpop.f32.mrf.mxu0 }
 0x117   : > { %v578_v5 = vpack.c.bf16 %v560_v2, %v558_v1  ;;  %v527_v8 = vadd.f32 %v526_v4, %v3672_v29  ;;  %v561_v16 = vmax.f32 %v525_v10, 0.0  ;;  %1930 = vmatpush1.bf16.msra.mxu1 %v3158_v40 }
 0x118   : > { %v528_v7 = vpop.f32.mrf.mxu0  ;;  %1931 = vmatprep.subr.bf16.mxu1 %v3166_v41 }
 0x119   : > { %v529_v9 = vadd.f32 %v528_v7, %v3675_v30  ;;  %877 = vmatprep.mubr.bf16.mxu1 %v578_v5  ;;  %v562_v14 = vmax.f32 %v527_v8, 0.0  ;;  %v3119_v30 = vld [vmem:[%s4391_s5 + $0xa0] ss:$8 sps:$4 sm:$0xff]  }
 0x11a   : > { %v530_v11 = vpop.f32.mrf.mxu0  ;;  %878 = vmatmul.mubr.bf16.gmra.mxu1 %v577_v6  ;;  %1177 = vmatpush2.bf16.msra.mxu0 %v3119_v30 }
 0x11b   : > { %v531_v12 = vadd.f32 %v530_v11, %v3672_v29  ;;  %v563_v13 = vmax.f32 %v529_v9, 0.0  ;;  %v3124_v29 = vld [vmem:[%s4391_s5 + $0x94] ss:$8 sps:$4 sm:$0xff]   ;;  %1932 = vmatpush1.bf16.msra.mxu1 %v3164_v42  ;;  %v3131_v9 = vld [vmem:[%s4393_s7 + $0x158] ss:$24 sps:$4 sm:$0xff]  }
 0x11c   : > { %1178 = vmatprep.subr.bf16.mxu0 %v3124_v29  ;;  %1933 = vmatprep.subr.bf16.mxu1 %v3172_v43  ;;  %v3145_v29 = vld [vmem:[%s4393_s7 + $0xfc] ss:$24 sps:$4 sm:$0xff]  }
 0x11d   : > { %v564_v15 = vmax.f32 %v531_v12, 0.0  ;;  %v579_v18 = vpack.c.bf16 %v563_v13, %v561_v16  ;;  %v3139_v12 = vld [vmem:[%s4393_s7 + $0x12c] ss:$24 sps:$4 sm:$0xff]   ;;  %v3157_v42 = vld [vmem:[%s4393_s7 + $0x9c] ss:$24 sps:$4 sm:$0xff]  }
 0x11e   : > { %1179 = vmatpush2.bf16.msra.mxu0 %v3122_v20 }
 0x11f   : > { %v580_v17 = vpack.c.bf16 %v564_v15, %v562_v14  ;;  %1180 = vmatprep.subr.bf16.mxu0 %v3127_v21  ;;  %1934 = vmatpush1.bf16.msra.mxu1 %v3170_v44 }
 0x120   : > { %1935 = vmatprep.subr.bf16.mxu1 %v3178_v45 }
 0x121   : > { %887 = vmatprep.mubr.bf16.mxu1 %v580_v17 }
 0x122   : > { %888 = vmatmul.mubr.bf16.gmra.mxu1 %v579_v18  ;;  %1181 = vmatpush2.bf16.msra.mxu0 %v3125_v22  ;;  %v3137_v18 = vld [vmem:[%s4393_s7 + $0x128] ss:$24 sps:$4 sm:$0xff]  }
 0x123   : > { %2032 = vmatprep.subr.bf16.mxu0 %v3133_v28  ;;  %1936 = vmatpush2.bf16.msra.mxu1 %v3176_v46  ;;  %v3143_v28 = vld [vmem:[%s4393_s7 + $0xf8] ss:$24 sps:$4 sm:$0xff]  }
 0x124   : > { %1937 = vmatprep.subr.bf16.mxu1 %v3184_v47 }
 0x127   : > { %1938 = vmatpush2.bf16.msra.mxu1 %v3182_v48  ;;  %v3155_v48 = vld [vmem:[%s4393_s7 + $0x98] ss:$24 sps:$4 sm:$0xff]  }
 0x128   : > { %1939 = vmatprep.subr.bf16.mxu1 %v3190_v49 }
 0x12b   : > { %1940 = vmatpush2.bf16.msra.mxu1 %v3188_v50 }
 0x12c   : > { %1941 = vmatprep.subr.bf16.mxu1 %v3196_v51  ;;  %v3163_v51 = vld [vmem:[%s4393_s7 + $0x6c] ss:$24 sps:$4 sm:$0xff]  }
 0x12f   : > { %1942 = vmatpush2.bf16.msra.mxu1 %v3194_v52 }
 0x130   : > { %1943 = vmatprep.subr.bf16.mxu1 %v3202_v53 }
 0x133   : > { %1944 = vmatpush2.bf16.msra.mxu1 %v3200_v54 }
 0x1aa   : > { %v819_v56 = vpop.f32.mrf.mxu1 }
 0x1ab   : > { %v820_v63 = vadd.f32 %v819_v56, %v3815_v58 }
 0x1ac   : > { %v821_v59 = vpop.f32.mrf.mxu1 }
 0x1ad   : > { %v822_v61 = vadd.f32 %v821_v59, %v3812_v57  ;;  %v898_v6 = vmax.f32 %v820_v63, 0.0  ;;  %v3161_v59 = vld [vmem:[%s4393_s7 + $0x68] ss:$24 sps:$4 sm:$0xff]  }
 0x1ae   : > { %v823_v60 = vpop.f32.mrf.mxu1 }
 0x1af   : > { %v824_v62 = vadd.f32 %v823_v60, %v3815_v58  ;;  %v899_v4 = vmax.f32 %v822_v61, 0.0 }
 0x1b0   : > { %v825_v0 = vpop.f32.mrf.mxu1 }
 0x1b1   : > { %v826_v1 = vadd.f32 %v825_v0, %v3812_v57  ;;  %v900_v2 = vmax.f32 %v824_v62, 0.0  ;;  %v3169_v62 = vld [vmem:[%s4393_s7 + $0x3c] ss:$24 sps:$4 sm:$0xff]  }
 0x1b2   : > { %v829_v3 = vpop.f32.mrf.mxu1 }
 0x1b3   : > { %v901_v5 = vmax.f32 %v826_v1, 0.0  ;;  %v930_v10 = vpack.c.bf16 %v900_v2, %v898_v6  ;;  %v830_v15 = vadd.f32 %v829_v3, %v3815_v58 }
 0x1b4   : > { %v831_v7 = vpop.f32.mrf.mxu1 }
 0x1b5   : > { %v931_v8 = vpack.c.bf16 %v901_v5, %v899_v4  ;;  %v832_v13 = vadd.f32 %v831_v7, %v3812_v57  ;;  %v902_v22 = vmax.f32 %v830_v15, 0.0  ;;  %v3167_v4 = vld [vmem:[%s4393_s7 + $0x38] ss:$24 sps:$4 sm:$0xff]   ;;  %v3175_v7 = vld [vmem:[%s4393_s7 + $0xc] ss:$24 sps:$4 sm:$0xff]  }
 0x1b6   : > { %v833_v11 = vpop.f32.mrf.mxu1 }
 0x1b7   : > { %v834_v14 = vadd.f32 %v833_v11, %v3815_v58  ;;  %1182 = vmatprep.mubr.bf16.mxu0 %v931_v8  ;;  %v903_v20 = vmax.f32 %v832_v13, 0.0  ;;  %v3173_v13 = vld [vmem:[%s4393_s7 + $0x8] ss:$24 sps:$4 sm:$0xff]  }
 0x1b8   : > { %v835_v16 = vpop.f32.mrf.mxu1  ;;  %1183 = vmatmul.mubr.bf16.vlgmr.msra.gmra.mxu0 %v930_v10 }
 0x1b9   : > { %v836_v17 = vadd.f32 %v835_v16, %v3812_v57  ;;  %2033 = vmatpush1.bf16.msra.mxu0 %v3131_v9  ;;  %v904_v19 = vmax.f32 %v834_v14, 0.0  ;;  %v3181_v16 = vld [vmem:[%s4393_s7 + $0x2dc] ss:$24 sps:$4 sm:$0xff]  }
 0x1ba   : > { %v839_v30 = vpop.f32.mrf.mxu1  ;;  %2034 = vmatprep.subr.bf16.mxu0 %v3139_v12 }
 0x1bb   : > { %v905_v21 = vmax.f32 %v836_v17, 0.0  ;;  %v932_v31 = vpack.c.bf16 %v904_v19, %v902_v22  ;;  %v840_v36 = vadd.f32 %v839_v30, %v3815_v58 }
 0x1bc   : > { %v841_v23 = vpop.f32.mrf.mxu1 }
 0x1bd   : > { %v933_v27 = vpack.c.bf16 %v905_v21, %v903_v20  ;;  %2035 = vmatpush1.bf16.msra.mxu0 %v3137_v18  ;;  %v842_v34 = vadd.f32 %v841_v23, %v3812_v57  ;;  %v906_v45 = vmax.f32 %v840_v36, 0.0  ;;  %v3179_v20 = vld [vmem:[%s4393_s7 + $0x2d8] ss:$24 sps:$4 sm:$0xff]   ;;  %v3187_v23 = vld [vmem:[%s4393_s7 + $0x2ac] ss:$24 sps:$4 sm:$0xff]  }
 0x1be   : > { %v843_v32 = vpop.f32.mrf.mxu1  ;;  %2036 = vmatprep.subr.bf16.mxu0 %v3145_v29 }
 0x1bf   : > { %v844_v35 = vadd.f32 %v843_v32, %v3815_v58  ;;  %1192 = vmatprep.mubr.bf16.mxu0 %v933_v27  ;;  %v907_v43 = vmax.f32 %v842_v34, 0.0  ;;  %v3185_v34 = vld [vmem:[%s4393_s7 + $0x2a8] ss:$24 sps:$4 sm:$0xff]  }
 0x1c0   : > { %v845_v37 = vpop.f32.mrf.mxu1  ;;  %1193 = vmatmul.mubr.bf16.gmra.mxu0 %v932_v31 }
 0x1c1   : > { %v846_v38 = vadd.f32 %v845_v37, %v3812_v57  ;;  %2037 = vmatpush1.bf16.msra.mxu0 %v3143_v28  ;;  %v908_v40 = vmax.f32 %v844_v35, 0.0  ;;  %v3193_v37 = vld [vmem:[%s4393_s7 + $0x27c] ss:$24 sps:$4 sm:$0xff]  }
 0x1c2   : > { %v849_v41 = vpop.f32.mrf.mxu1  ;;  %2038 = vmatprep.subr.bf16.mxu0 %v3151_v33 }
 0x1c3   : > { %v909_v44 = vmax.f32 %v846_v38, 0.0  ;;  %v934_v49 = vpack.c.bf16 %v908_v40, %v906_v45  ;;  %v850_v54 = vadd.f32 %v849_v41, %v3815_v58 }
 0x1c4   : > { %v851_v46 = vpop.f32.mrf.mxu1 }
 0x1c5   : > { %v935_v47 = vpack.c.bf16 %v909_v44, %v907_v43  ;;  %2039 = vmatpush1.bf16.msra.mxu0 %v3149_v39  ;;  %v852_v52 = vadd.f32 %v851_v46, %v3812_v57  ;;  %v910_v1 = vmax.f32 %v850_v54, 0.0  ;;  %v3191_v43 = vld [vmem:[%s4393_s7 + $0x278] ss:$24 sps:$4 sm:$0xff]   ;;  %v3199_v46 = vld [vmem:[%s4393_s7 + $0x24c] ss:$24 sps:$4 sm:$0xff]  }
 0x1c6   : > { %v853_v50 = vpop.f32.mrf.mxu1  ;;  %2040 = vmatprep.subr.bf16.mxu0 %v3157_v42 }
 0x1c7   : > { %v854_v53 = vadd.f32 %v853_v50, %v3815_v58  ;;  %1202 = vmatprep.mubr.bf16.mxu0 %v935_v47  ;;  %v911_v63 = vmax.f32 %v852_v52, 0.0  ;;  %v3197_v52 = vld [vmem:[%s4393_s7 + $0x248] ss:$24 sps:$4 sm:$0xff]  }
 0x1c8   : > { %v855_v55 = vpop.f32.mrf.mxu1  ;;  %1203 = vmatmul.mubr.bf16.gmra.mxu0 %v934_v49 }
 0x1c9   : > { %v856_v56 = vadd.f32 %v855_v55, %v3812_v57  ;;  %2041 = vmatpush1.bf16.msra.mxu0 %v3155_v48  ;;  %v912_v60 = vmax.f32 %v854_v53, 0.0  ;;  %v3205_v55 = vld [vmem:[%s4393_s7 + $0x21c] ss:$24 sps:$4 sm:$0xff]  }
 0x1ca   : > { %v859_v61 = vpop.f32.mrf.mxu1  ;;  %2042 = vmatprep.subr.bf16.mxu0 %v3163_v51 }
 0x1cb   : > { %v913_v0 = vmax.f32 %v856_v56, 0.0  ;;  %v936_v5 = vpack.c.bf16 %v912_v60, %v910_v1  ;;  %v860_v10 = vadd.f32 %v859_v61, %v3815_v58 }
 0x1cc   : > { %v861_v2 = vpop.f32.mrf.mxu1 }
 0x1cd   : > { %v937_v3 = vpack.c.bf16 %v913_v0, %v911_v63  ;;  %2043 = vmatpush1.bf16.msra.mxu0 %v3161_v59  ;;  %v862_v8 = vadd.f32 %v861_v2, %v3812_v57  ;;  %v914_v19 = vmax.f32 %v860_v10, 0.0  ;;  %v3203_v63 = vld [vmem:[%s4393_s7 + $0x218] ss:$24 sps:$4 sm:$0xff]  }
 0x1ce   : > { %v863_v6 = vpop.f32.mrf.mxu1  ;;  %2044 = vmatprep.subr.bf16.mxu0 %v3169_v62 }
 0x1cf   : > { %v864_v9 = vadd.f32 %v863_v6, %v3815_v58  ;;  %1212 = vmatprep.mubr.bf16.mxu0 %v937_v3  ;;  %v915_v17 = vmax.f32 %v862_v8, 0.0 }
 0x1d0   : > { %v865_v11 = vpop.f32.mrf.mxu1  ;;  %1213 = vmatmul.mubr.bf16.gmra.mxu0 %v936_v5 }
 0x1d1   : > { %v866_v12 = vadd.f32 %v865_v11, %v3812_v57  ;;  %2045 = vmatpush1.bf16.msra.mxu0 %v3167_v4  ;;  %v916_v14 = vmax.f32 %v864_v9, 0.0 }
 0x1d2   : > { %v869_v15 = vpop.f32.mrf.mxu1  ;;  %2046 = vmatprep.subr.bf16.mxu0 %v3175_v7 }
 0x1d3   : > { %v917_v18 = vmax.f32 %v866_v12, 0.0  ;;  %v938_v21 = vpack.c.bf16 %v916_v14, %v914_v19  ;;  %v870_v31 = vadd.f32 %v869_v15, %v3815_v58  ;;  %v3209_v14 = vld [vmem:[%s4393_s7 + $0x1e8] ss:$24 sps:$4 sm:$0xff]   ;;  %v3214_v15 = vld [vmem:[%s4393_s7 + $0x1b4] ss:$24 sps:$4 sm:$0xff]  }
 0x1d4   : > { %v871_v30 = vpop.f32.mrf.mxu1  ;;  %v3220_v19 = vld [vmem:[%s4393_s7 + $0x184] ss:$24 sps:$4 sm:$0xff]  }
 0x1d5   : > { %v939_v29 = vpack.c.bf16 %v917_v18, %v915_v17  ;;  %2047 = vmatpush1.bf16.msra.mxu0 %v3173_v13  ;;  %v872_v27 = vadd.f32 %v871_v30, %v3812_v57  ;;  %v918_v40 = vmax.f32 %v870_v31, 0.0  ;;  %v3208_v13 = vld [vmem:[%s4393_s7 + $0x1e4] ss:$24 sps:$4 sm:$0xff]   ;;  %v3212_v17 = vld [vmem:[%s4393_s7 + $0x1b0] ss:$24 sps:$4 sm:$0xff]  }
 0x1d6   : > { %v873_v22 = vpop.f32.mrf.mxu1  ;;  %2048 = vmatprep.subr.bf16.mxu0 %v3181_v16  ;;  %1945 = vmatprep.subr.bf16.mxu1 %v3208_v13  ;;  %v3217_v16 = vld [vmem:[%s4393_s7 + $0x1bc] ss:$24 sps:$4 sm:$0xff]   ;;  %v3215_v18 = vld [vmem:[%s4393_s7 + $0x1b8] ss:$24 sps:$4 sm:$0xff]   ;;  %v3223_v30 = vld [vmem:[%s4393_s7 + $0x18c] ss:$24 sps:$4 sm:$0xff]  }
 0x1d7   : > { %v874_v28 = vadd.f32 %v873_v22, %v3815_v58  ;;  %1222 = vmatprep.mubr.bf16.mxu0 %v939_v29  ;;  %v919_v38 = vmax.f32 %v872_v27, 0.0  ;;  %v3218_v29 = vld [vmem:[%s4393_s7 + $0x180] ss:$24 sps:$4 sm:$0xff]   ;;  %v3238_v13 = vld [vmem:[%s4393_s7 + $0xa4] ss:$24 sps:$4 sm:$0xff]  }
 0x1d8   : > { %v875_v32 = vpop.f32.mrf.mxu1  ;;  %1223 = vmatmul.mubr.bf16.gmra.mxu0 %v938_v21  ;;  %v3226_v21 = vld [vmem:[%s4393_s7 + $0x164] ss:$24 sps:$4 sm:$0xff]   ;;  %v978_v22 = vld [vmem:[%s4392_s6] sm:$0x3] }
 0x1d9   : > { %v876_v33 = vadd.f32 %v875_v32, %v3812_v57  ;;  %2049 = vmatpush2.bf16.msra.mxu0 %v3179_v20  ;;  %v920_v35 = vmax.f32 %v874_v28, 0.0  ;;  %v3221_v20 = vld [vmem:[%s4393_s7 + $0x188] ss:$24 sps:$4 sm:$0xff]   ;;  %v3967_v27 = vrot.slane %v978_v22, %v3663_v25  ;;  %v3970_v28 = vrot.slane %v978_v22, %v3666_v26 }
 0x1da   : > { %v879_v36 = vpop.f32.mrf.mxu1  ;;  %2050 = vmatprep.subr.bf16.mxu0 %v3187_v23 }
 0x1db   : > { %v921_v39 = vmax.f32 %v876_v33, 0.0  ;;  %v940_v44 = vpack.c.bf16 %v920_v35, %v918_v40  ;;  %v880_v49 = vadd.f32 %v879_v36, %v3815_v58 }
 0x1dc   : > { %v881_v41 = vpop.f32.mrf.mxu1 }
 0x1dd   : > { %v941_v42 = vpack.c.bf16 %v921_v39, %v919_v38  ;;  %2051 = vmatpush2.bf16.msra.mxu0 %v3185_v34  ;;  %v882_v47 = vadd.f32 %v881_v41, %v3812_v57  ;;  %v922_v60 = vmax.f32 %v880_v49, 0.0 }
 0x1de   : > { %v883_v45 = vpop.f32.mrf.mxu1  ;;  %2052 = vmatprep.subr.bf16.mxu0 %v3193_v37 }
 0x1df   : > { %v884_v48 = vadd.f32 %v883_v45, %v3815_v58  ;;  %1232 = vmatprep.mubr.bf16.mxu0 %v941_v42  ;;  %v923_v56 = vmax.f32 %v882_v47, 0.0  ;;  %v3224_v45 = vld [vmem:[%s4393_s7 + $0x160] ss:$24 sps:$4 sm:$0xff]  }
 0x1e0   : > { %v885_v50 = vpop.f32.mrf.mxu1  ;;  %1233 = vmatmul.mubr.bf16.gmra.mxu0 %v940_v44 }
 0x1e1   : > { %v886_v51 = vadd.f32 %v885_v50, %v3812_v57  ;;  %2053 = vmatpush2.bf16.msra.mxu0 %v3191_v43  ;;  %v924_v53 = vmax.f32 %v884_v48, 0.0  ;;  %v3229_v48 = vld [vmem:[%s4393_s7 + $0x134] ss:$24 sps:$4 sm:$0xff]  }
 0x1e2   : > { %v889_v54 = vpop.f32.mrf.mxu1  ;;  %2054 = vmatprep.subr.bf16.mxu0 %v3199_v46 }
 0x1e3   : > { %v925_v59 = vmax.f32 %v886_v51, 0.0  ;;  %v942_v0 = vpack.c.bf16 %v924_v53, %v922_v60  ;;  %v890_v4 = vadd.f32 %v889_v54, %v3815_v58  ;;  %v3227_v54 = vld [vmem:[%s4393_s7 + $0x130] ss:$24 sps:$4 sm:$0xff]  }
 0x1e4   : > { %v891_v61 = vpop.f32.mrf.mxu1 }
 0x1e5   : > { %v943_v62 = vpack.c.bf16 %v925_v59, %v923_v56  ;;  %2055 = vmatpush2.bf16.msra.mxu0 %v3197_v52  ;;  %v892_v2 = vadd.f32 %v891_v61, %v3812_v57  ;;  %v926_v10 = vmax.f32 %v890_v4, 0.0  ;;  %v3232_v59 = vld [vmem:[%s4393_s7 + $0x104] ss:$24 sps:$4 sm:$0xff]   ;;  %v3235_v4 = vld [vmem:[%s4393_s7 + $0xd4] ss:$24 sps:$4 sm:$0xff]  }
 0x1e6   : > { %v893_v1 = vpop.f32.mrf.mxu1  ;;  %2056 = vmatprep.subr.bf16.mxu0 %v3205_v55 }
 0x1e7   : > { %v894_v3 = vadd.f32 %v893_v1, %v3815_v58  ;;  %1242 = vmatprep.mubr.bf16.mxu0 %v943_v62  ;;  %v927_v8 = vmax.f32 %v892_v2, 0.0  ;;  %v3211_v58 = vld [vmem:[%s4393_s7 + $0x1ec] ss:$24 sps:$4 sm:$0xff]   ;;  %v3230_v1 = vld [vmem:[%s4393_s7 + $0x100] ss:$24 sps:$4 sm:$0xff]  }
 0x1e8   : > { %v895_v5 = vpop.f32.mrf.mxu1  ;;  %1243 = vmatmul.mubr.bf16.gmra.mxu0 %v942_v0 }
 0x1e9   : > { %v896_v6 = vadd.f32 %v895_v5, %v3812_v57  ;;  %2057 = vmatpush2.bf16.msra.mxu0 %v3203_v63  ;;  %v928_v7 = vmax.f32 %v894_v3, 0.0  ;;  %v3206_v57 = vld [vmem:[%s4393_s7 + $0x1e0] ss:$24 sps:$4 sm:$0xff]  }
 0x1ea   : > { %2058 = vmatprep.subr.bf16.mxu0 %v3211_v58  ;;  %1946 = vmatpush2.bf16.msra.mxu1 %v3206_v57 }
 0x1eb   : > { %v929_v9 = vmax.f32 %v896_v6, 0.0  ;;  %v944_v12 = vpack.c.bf16 %v928_v7, %v926_v10  ;;  %1947 = vmatprep.subr.bf16.mxu1 %v3214_v15  ;;  %v3233_v10 = vld [vmem:[%s4393_s7 + $0xd0] ss:$24 sps:$4 sm:$0xff]  }
 0x1ed   : > { %v945_v11 = vpack.c.bf16 %v929_v9, %v927_v8  ;;  %2059 = vmatpush2.bf16.msra.mxu0 %v3209_v14 }
 0x1ee   : > { %2060 = vmatprep.subr.bf16.mxu0 %v3217_v16  ;;  %1948 = vmatpush2.bf16.msra.mxu1 %v3212_v17  ;;  %v3236_v17 = vld [vmem:[%s4393_s7 + $0xa0] ss:$24 sps:$4 sm:$0xff]  }
 0x1ef   : > { %1252 = vmatprep.mubr.bf16.mxu0 %v945_v11  ;;  %1949 = vmatprep.subr.bf16.mxu1 %v3220_v19 }
 0x1f0   : > { %1253 = vmatmul.mubr.bf16.gmra.mxu0 %v944_v12 }
 0x1f1   : > { %2061 = vmatpush2.bf16.msra.mxu0 %v3215_v18 }
 0x1f2   : > { %2062 = vmatprep.subr.bf16.mxu0 %v3223_v30  ;;  %1950 = vmatpush2.bf16.msra.mxu1 %v3218_v29  ;;  %v3241_v30 = vld [vmem:[%s4393_s7 + $0x74] ss:$24 sps:$4 sm:$0xff]  }
 0x1f3   : > { %2950 = vmatprep.subr.bf16.mxu1 %v3226_v21 }
 0x1f5   : > { %2063 = vmatpush2.bf16.msra.mxu0 %v3221_v20 }
 0x1f6   : > { %2145 = vmatprep.subr.bf16.mxu0 %v3226_v21 }
 0x278   : > { %v1184_v23 = vpop.f32.mrf.mxu0 }
 0x279   : > { %v1185_v35 = vadd.f32 %v1184_v23, %v3970_v28 }
 0x27a   : > { %v1186_v31 = vpop.f32.mrf.mxu0 }
 0x27b   : > { %v1187_v33 = vadd.f32 %v1186_v31, %v3967_v27  ;;  %v1263_v42 = vmax.f32 %v1185_v35, 0.0  ;;  %v3239_v31 = vld [vmem:[%s4393_s7 + $0x70] ss:$24 sps:$4 sm:$0xff]  }
 0x27c   : > { %v1188_v32 = vpop.f32.mrf.mxu0 }
 0x27d   : > { %v1189_v34 = vadd.f32 %v1188_v32, %v3970_v28  ;;  %v1264_v40 = vmax.f32 %v1187_v33, 0.0 }
 0x27e   : > { %v1190_v36 = vpop.f32.mrf.mxu0 }
 0x27f   : > { %v1191_v37 = vadd.f32 %v1190_v36, %v3967_v27  ;;  %v1265_v38 = vmax.f32 %v1189_v34, 0.0  ;;  %v3244_v34 = vld [vmem:[%s4393_s7 + $0x44] ss:$24 sps:$4 sm:$0xff]  }
 0x280   : > { %v1194_v39 = vpop.f32.mrf.mxu0 }
 0x281   : > { %v1266_v41 = vmax.f32 %v1191_v37, 0.0  ;;  %v3981_v46 = vpack.c.bf16 %v1265_v38, %v1263_v42  ;;  %v1195_v51 = vadd.f32 %v1194_v39, %v3970_v28 }
 0x282   : > { %v1196_v43 = vpop.f32.mrf.mxu0 }
 0x283   : > { %v3976_v44 = vpack.c.bf16 %v1266_v41, %v1264_v40  ;;  %v1197_v49 = vadd.f32 %v1196_v43, %v3967_v27  ;;  %v1267_v62 = vmax.f32 %v1195_v51, 0.0  ;;  %v3242_v40 = vld [vmem:[%s4393_s7 + $0x40] ss:$24 sps:$4 sm:$0xff]   ;;  %v3247_v43 = vld [vmem:[%s4393_s7 + $0x14] ss:$24 sps:$4 sm:$0xff]  }
 0x284   : > { %v1198_v47 = vpop.f32.mrf.mxu0  ;;  %v3245_v51 = vld [vmem:[%s4393_s7 + $0x10] ss:$24 sps:$4 sm:$0xff]  }
 0x285   : > { %v1199_v50 = vadd.f32 %v1198_v47, %v3970_v28  ;;  %1951 = vmatprep.mubr.bf16.mxu1 %v3976_v44  ;;  %2064 = vmatprep.mubr.bf16.mxu0 %v3976_v44  ;;  %v1268_v60 = vmax.f32 %v1197_v49, 0.0 }
 0x286   : > { %v1200_v52 = vpop.f32.mrf.mxu0  ;;  %1952 = vmatmul.mubr.bf16.vlgmr.msra.gmra.mxu1 %v3981_v46  ;;  %2065 = vmatmul.mubr.bf16.vlgmr.msra.gmra.mxu0 %v3981_v46 }
 0x287   : > { %v1201_v53 = vadd.f32 %v1200_v52, %v3967_v27  ;;  %2966 = vmatpush1.bf16.msra.mxu1 %v3224_v45  ;;  %2146 = vmatpush1.bf16.msra.mxu0 %v3224_v45  ;;  %v1269_v55 = vmax.f32 %v1199_v50, 0.0 }
 0x288   : > { %v1204_v56 = vpop.f32.mrf.mxu0  ;;  %2951 = vmatprep.subr.bf16.mxu1 %v3229_v48  ;;  %2147 = vmatprep.subr.bf16.mxu0 %v3229_v48 }
 0x289   : > { %v1270_v61 = vmax.f32 %v1201_v53, 0.0  ;;  %v4005_v2 = vpack.c.bf16 %v1269_v55, %v1267_v62  ;;  %v1205_v7 = vadd.f32 %v1204_v56, %v3970_v28  ;;  %v3248_v62 = vld [vmem:[%s4393_s7 + $0x2e0] ss:$24 sps:$4 sm:$0xff]  }
 0x28a   : > { %v1206_v63 = vpop.f32.mrf.mxu0 }
 0x28b   : > { %v4000_v0 = vpack.c.bf16 %v1270_v61, %v1268_v60  ;;  %2967 = vmatpush1.bf16.msra.mxu1 %v3227_v54  ;;  %2148 = vmatpush1.bf16.msra.mxu0 %v3227_v54  ;;  %v1207_v5 = vadd.f32 %v1206_v63, %v3967_v27  ;;  %v1271_v14 = vmax.f32 %v1205_v7, 0.0  ;;  %v3250_v54 = vld [vmem:[%s4393_s7 + $0x2e4] ss:$24 sps:$4 sm:$0xff]  }
 0x28c   : > { %v1208_v3 = vpop.f32.mrf.mxu0  ;;  %2952 = vmatprep.subr.bf16.mxu1 %v3232_v59  ;;  %2149 = vmatprep.subr.bf16.mxu0 %v3232_v59 }
 0x28d   : > { %v1209_v6 = vadd.f32 %v1208_v3, %v3970_v28  ;;  %1961 = vmatprep.mubr.bf16.mxu1 %v4000_v0  ;;  %2074 = vmatprep.mubr.bf16.mxu0 %v4000_v0  ;;  %v1272_v58 = vmax.f32 %v1207_v5, 0.0  ;;  %v3253_v3 = vld [vmem:[%s4393_s7 + $0x2b4] ss:$24 sps:$4 sm:$0xff]  }
 0x28e   : > { %v1210_v8 = vpop.f32.mrf.mxu0  ;;  %1962 = vmatmul.mubr.bf16.gmra.mxu1 %v4005_v2  ;;  %2075 = vmatmul.mubr.bf16.gmra.mxu0 %v4005_v2 }
 0x28f   : > { %v1211_v9 = vadd.f32 %v1210_v8, %v3967_v27  ;;  %2968 = vmatpush1.bf16.msra.mxu1 %v3230_v1  ;;  %2150 = vmatpush1.bf16.msra.mxu0 %v3230_v1  ;;  %v1273_v11 = vmax.f32 %v1209_v6, 0.0 }
 0x290   : > { %v1214_v12 = vpop.f32.mrf.mxu0  ;;  %2953 = vmatprep.subr.bf16.mxu1 %v3235_v4  ;;  %2151 = vmatprep.subr.bf16.mxu0 %v3235_v4 }
 0x291   : > { %v1274_v57 = vmax.f32 %v1211_v9, 0.0  ;;  %v4029_v18 = vpack.c.bf16 %v1273_v11, %v1271_v14  ;;  %v1215_v21 = vadd.f32 %v1214_v12, %v3970_v28  ;;  %v3251_v9 = vld [vmem:[%s4393_s7 + $0x2b0] ss:$24 sps:$4 sm:$0xff]   ;;  %v3256_v12 = vld [vmem:[%s4393_s7 + $0x284] ss:$24 sps:$4 sm:$0xff]  }
 0x292   : > { %v1216_v15 = vpop.f32.mrf.mxu0 }
 0x293   : > { %v4024_v16 = vpack.c.bf16 %v1274_v57, %v1272_v58  ;;  %2969 = vmatpush1.bf16.msra.mxu1 %v3233_v10  ;;  %2152 = vmatpush1.bf16.msra.mxu0 %v3233_v10  ;;  %v1217_v29 = vadd.f32 %v1216_v15, %v3967_v27  ;;  %v1275_v37 = vmax.f32 %v1215_v21, 0.0 }
 0x294   : > { %v1218_v19 = vpop.f32.mrf.mxu0  ;;  %2954 = vmatprep.subr.bf16.mxu1 %v3238_v13  ;;  %2153 = vmatprep.subr.bf16.mxu0 %v3238_v13 }
 0x295   : > { %v1219_v20 = vadd.f32 %v1218_v19, %v3970_v28  ;;  %1971 = vmatprep.mubr.bf16.mxu1 %v4024_v16  ;;  %2084 = vmatprep.mubr.bf16.mxu0 %v4024_v16  ;;  %v1276_v35 = vmax.f32 %v1217_v29, 0.0  ;;  %v3259_v29 = vld [vmem:[%s4393_s7 + $0x254] ss:$24 sps:$4 sm:$0xff]  }
 0x296   : > { %v1220_v22 = vpop.f32.mrf.mxu0  ;;  %1972 = vmatmul.mubr.bf16.gmra.mxu1 %v4029_v18  ;;  %2085 = vmatmul.mubr.bf16.gmra.mxu0 %v4029_v18 }
 0x297   : > { %v1221_v23 = vadd.f32 %v1220_v22, %v3967_v27  ;;  %2970 = vmatpush1.bf16.msra.mxu1 %v3236_v17  ;;  %2154 = vmatpush1.bf16.msra.mxu0 %v3236_v17  ;;  %v1277_v32 = vmax.f32 %v1219_v20, 0.0  ;;  %v3254_v17 = vld [vmem:[%s4393_s7 + $0x280] ss:$24 sps:$4 sm:$0xff]  }
 0x298   : > { %v1224_v33 = vpop.f32.mrf.mxu0  ;;  %2955 = vmatprep.subr.bf16.mxu1 %v3241_v30  ;;  %2155 = vmatprep.subr.bf16.mxu0 %v3241_v30 }
 0x299   : > { %v1278_v36 = vmax.f32 %v1221_v23, 0.0  ;;  %v4053_v41 = vpack.c.bf16 %v1277_v32, %v1275_v37  ;;  %v1225_v48 = vadd.f32 %v1224_v33, %v3970_v28  ;;  %v3257_v32 = vld [vmem:[%s4393_s7 + $0x250] ss:$24 sps:$4 sm:$0xff]  }
 0x29a   : > { %v1226_v38 = vpop.f32.mrf.mxu0 }
 0x29b   : > { %v4048_v39 = vpack.c.bf16 %v1278_v36, %v1276_v35  ;;  %2971 = vmatpush1.bf16.msra.mxu1 %v3239_v31  ;;  %2156 = vmatpush1.bf16.msra.mxu0 %v3239_v31  ;;  %v1227_v45 = vadd.f32 %v1226_v38, %v3967_v27  ;;  %v1279_v59 = vmax.f32 %v1225_v48, 0.0  ;;  %v3262_v35 = vld [vmem:[%s4393_s7 + $0x224] ss:$24 sps:$4 sm:$0xff]   ;;  %v3265_v48 = vld [vmem:[%s4393_s7 + $0x1f4] ss:$24 sps:$4 sm:$0xff]  }
 0x29c   : > { %v1228_v42 = vpop.f32.mrf.mxu0  ;;  %2956 = vmatprep.subr.bf16.mxu1 %v3244_v34  ;;  %2157 = vmatprep.subr.bf16.mxu0 %v3244_v34 }
 0x29d   : > { %v1229_v47 = vadd.f32 %v1228_v42, %v3970_v28  ;;  %1981 = vmatprep.mubr.bf16.mxu1 %v4048_v39  ;;  %2094 = vmatprep.mubr.bf16.mxu0 %v4048_v39  ;;  %v1280_v55 = vmax.f32 %v1227_v45, 0.0 }
 0x29e   : > { %v1230_v49 = vpop.f32.mrf.mxu0  ;;  %1982 = vmatmul.mubr.bf16.gmra.mxu1 %v4053_v41  ;;  %2095 = vmatmul.mubr.bf16.gmra.mxu0 %v4053_v41 }
 0x29f   : > { %v1231_v50 = vadd.f32 %v1230_v49, %v3967_v27  ;;  %2972 = vmatpush1.bf16.msra.mxu1 %v3242_v40  ;;  %2158 = vmatpush1.bf16.msra.mxu0 %v3242_v40  ;;  %v1281_v52 = vmax.f32 %v1229_v47, 0.0 }
 0x2a0   : > { %v1234_v53 = vpop.f32.mrf.mxu0  ;;  %2957 = vmatprep.subr.bf16.mxu1 %v3247_v43  ;;  %2159 = vmatprep.subr.bf16.mxu0 %v3247_v43  ;;  %v3260_v43 = vld [vmem:[%s4393_s7 + $0x220] ss:$24 sps:$4 sm:$0xff]  }
 0x2a1   : > { %v1282_v56 = vmax.f32 %v1231_v50, 0.0  ;;  %v4077_v63 = vpack.c.bf16 %v1281_v52, %v1279_v59  ;;  %v1235_v6 = vadd.f32 %v1234_v53, %v3970_v28 }
 0x2a2   : > { %v1236_v60 = vpop.f32.mrf.mxu0 }
 0x2a3   : > { %v4072_v61 = vpack.c.bf16 %v1282_v56, %v1280_v55  ;;  %2973 = vmatpush1.bf16.msra.mxu1 %v3245_v51  ;;  %2160 = vmatpush1.bf16.msra.mxu0 %v3245_v51  ;;  %v1237_v4 = vadd.f32 %v1236_v60, %v3967_v27  ;;  %v1283_v57 = vmax.f32 %v1235_v6, 0.0  ;;  %v3268_v56 = vld [vmem:[%s4393_s7 + $0x1c4] ss:$24 sps:$4 sm:$0xff]  }
 0x2a4   : > { %v1238_v1 = vpop.f32.mrf.mxu0  ;;  %2958 = vmatprep.subr.bf16.mxu1 %v3250_v54  ;;  %2161 = vmatprep.subr.bf16.mxu0 %v3250_v54  ;;  %v3263_v54 = vld [vmem:[%s4393_s7 + $0x1f0] ss:$24 sps:$4 sm:$0xff]  }
 0x2a5   : > { %v1239_v5 = vadd.f32 %v1238_v1, %v3970_v28  ;;  %1991 = vmatprep.mubr.bf16.mxu1 %v4072_v61  ;;  %2104 = vmatprep.mubr.bf16.mxu0 %v4072_v61  ;;  %v1284_v13 = vmax.f32 %v1237_v4, 0.0  ;;  %v3269_v4 = vld [vmem:[%s4393_s7 + $0x190] ss:$24 sps:$4 sm:$0xff]  }
 0x2a6   : > { %v1240_v7 = vpop.f32.mrf.mxu0  ;;  %1992 = vmatmul.mubr.bf16.gmra.mxu1 %v4077_v63  ;;  %2105 = vmatmul.mubr.bf16.gmra.mxu0 %v4077_v63 }
 0x2a7   : > { %v1241_v8 = vadd.f32 %v1240_v7, %v3967_v27  ;;  %2974 = vmatpush2.bf16.msra.mxu1 %v3248_v62  ;;  %2162 = vmatpush2.bf16.msra.mxu0 %v3248_v62  ;;  %v1285_v10 = vmax.f32 %v1239_v5, 0.0 }
 0x2a8   : > { %v1244_v11 = vpop.f32.mrf.mxu0  ;;  %2959 = vmatprep.subr.bf16.mxu1 %v3253_v3  ;;  %2163 = vmatprep.subr.bf16.mxu0 %v3253_v3  ;;  %v3271_v3 = vld [vmem:[%s4393_s7 + $0x194] ss:$24 sps:$4 sm:$0xff]  }
 0x2a9   : > { %v1286_v58 = vmax.f32 %v1241_v8, 0.0  ;;  %v4101_v19 = vpack.c.bf16 %v1285_v10, %v1283_v57  ;;  %v1245_v22 = vadd.f32 %v1244_v11, %v3970_v28 }
 0x2aa   : > { %v1246_v14 = vpop.f32.mrf.mxu0 }
 0x2ab   : > { %v4096_v15 = vpack.c.bf16 %v1286_v58, %v1284_v13  ;;  %2975 = vmatpush2.bf16.msra.mxu1 %v3251_v9  ;;  %2164 = vmatpush2.bf16.msra.mxu0 %v3251_v9  ;;  %v1247_v20 = vadd.f32 %v1246_v14, %v3967_v27  ;;  %v1287_v38 = vmax.f32 %v1245_v22, 0.0 }
 0x2ac   : > { %v1248_v30 = vpop.f32.mrf.mxu0  ;;  %2960 = vmatprep.subr.bf16.mxu1 %v3256_v12  ;;  %2165 = vmatprep.subr.bf16.mxu0 %v3256_v12 }
 0x2ad   : > { %v1249_v21 = vadd.f32 %v1248_v30, %v3970_v28  ;;  %2001 = vmatprep.mubr.bf16.mxu1 %v4096_v15  ;;  %2114 = vmatprep.mubr.bf16.mxu0 %v4096_v15  ;;  %v1288_v36 = vmax.f32 %v1247_v20, 0.0 }
 0x2ae   : > { %v1250_v23 = vpop.f32.mrf.mxu0  ;;  %2002 = vmatmul.mubr.bf16.gmra.mxu1 %v4101_v19  ;;  %2115 = vmatmul.mubr.bf16.gmra.mxu0 %v4101_v19 }
 0x2af   : > { %v1251_v31 = vadd.f32 %v1250_v23, %v3967_v27  ;;  %2976 = vmatpush2.bf16.msra.mxu1 %v3254_v17  ;;  %2166 = vmatpush2.bf16.msra.mxu0 %v3254_v17  ;;  %v1289_v33 = vmax.f32 %v1249_v21, 0.0 }
 0x2b0   : > { %v1254_v34 = vpop.f32.mrf.mxu0  ;;  %2961 = vmatprep.subr.bf16.mxu1 %v3259_v29  ;;  %2167 = vmatprep.subr.bf16.mxu0 %v3259_v29 }
 0x2b1   : > { %v1290_v37 = vmax.f32 %v1251_v31, 0.0  ;;  %v1307_v45 = vpack.c.bf16 %v1289_v33, %v1287_v38  ;;  %v1255_v51 = vadd.f32 %v1254_v34, %v3970_v28 }
 0x2b2   : > { %v1256_v40 = vpop.f32.mrf.mxu0 }
 0x2b3   : > { %v1308_v42 = vpack.c.bf16 %v1290_v37, %v1288_v36  ;;  %2977 = vmatpush2.bf16.msra.mxu1 %v3257_v32  ;;  %2168 = vmatpush2.bf16.msra.mxu0 %v3257_v32  ;;  %v1257_v49 = vadd.f32 %v1256_v40, %v3967_v27  ;;  %v1291_v60 = vmax.f32 %v1255_v51, 0.0 }
 0x2b4   : > { %v1258_v47 = vpop.f32.mrf.mxu0  ;;  %2962 = vmatprep.subr.bf16.mxu1 %v3262_v35  ;;  %2169 = vmatprep.subr.bf16.mxu0 %v3262_v35 }
 0x2b5   : > { %v1259_v50 = vadd.f32 %v1258_v47, %v3970_v28  ;;  %2011 = vmatprep.mubr.bf16.mxu1 %v1308_v42  ;;  %2124 = vmatprep.mubr.bf16.mxu0 %v1308_v42  ;;  %v1292_v59 = vmax.f32 %v1257_v49, 0.0 }
 0x2b6   : > { %v1260_v52 = vpop.f32.mrf.mxu0  ;;  %2012 = vmatmul.mubr.bf16.gmra.mxu1 %v1307_v45  ;;  %2125 = vmatmul.mubr.bf16.gmra.mxu0 %v1307_v45 }
 0x2b7   : > { %v1261_v53 = vadd.f32 %v1260_v52, %v3967_v27  ;;  %2978 = vmatpush2.bf16.msra.mxu1 %v3260_v43  ;;  %2170 = vmatpush2.bf16.msra.mxu0 %v3260_v43  ;;  %v1293_v55 = vmax.f32 %v1259_v50, 0.0  ;;  %v3266_v27 = vld [vmem:[%s4393_s7 + $0x1c0] ss:$24 sps:$4 sm:$0xff]  }
 0x2b8   : > { %2963 = vmatprep.subr.bf16.mxu1 %v3265_v48  ;;  %2171 = vmatprep.subr.bf16.mxu0 %v3265_v48 }
 0x2b9   : > { %v1294_v28 = vmax.f32 %v1261_v53, 0.0  ;;  %v1309_v1 = vpack.c.bf16 %v1293_v55, %v1291_v60 }
 0x2bb   : > { %v1310_v62 = vpack.c.bf16 %v1294_v28, %v1292_v59  ;;  %2979 = vmatpush2.bf16.msra.mxu1 %v3263_v54  ;;  %2172 = vmatpush2.bf16.msra.mxu0 %v3263_v54 }
 0x2bc   : > { %2964 = vmatprep.subr.bf16.mxu1 %v3268_v56  ;;  %2173 = vmatprep.subr.bf16.mxu0 %v3268_v56 }
 0x2bd   : > { %2021 = vmatprep.mubr.bf16.mxu1 %v1310_v62  ;;  %2134 = vmatprep.mubr.bf16.mxu0 %v1310_v62 }
 0x2be   : > { %2022 = vmatmul.mubr.bf16.gmra.mxu1 %v1309_v1  ;;  %2135 = vmatmul.mubr.bf16.gmra.mxu0 %v1309_v1 }
 0x2bf   : > { %2980 = vmatpush2.bf16.msra.mxu1 %v3266_v27  ;;  %2174 = vmatpush2.bf16.msra.mxu0 %v3266_v27 }
 0x2c0   : > { %2177 = vmatprep.mubr.bf16.mxu0 %v3976_v44  ;;  %2207 = vmatprep.mubr.bf16.mxu1 %v4048_v39  ;;  %v1419_v44 = vsub.s32 2, %v3660_v24 }
 0x2c1   : > { %2965 = vmatprep.subr.bf16.mxu1 %v3271_v3  ;;  %2175 = vmatprep.subr.bf16.mxu0 %v3271_v3 }
 0x2c3   : > { %2981 = vmatpush2.bf16.msra.mxu1 %v3269_v4  ;;  %2176 = vmatpush2.bf16.msra.mxu0 %v3269_v4 }
 0x2c6   : > { %2178 = vmatmul.mubr.bf16.vlgmr.msra.gmra.mxu0 %v3981_v46  ;;  %2208 = vmatmul.mubr.bf16.vlgmr.msra.gmra.mxu1 %v4053_v41  ;;  %v1423_v46 = vsub.s32 3, %v3660_v24 }
 0x2c7   : > { %2187 = vmatprep.mubr.bf16.mxu0 %v4000_v0  ;;  %2217 = vmatprep.mubr.bf16.mxu1 %v4072_v61  ;;  %v4162_v0 = vld [vmem:[%s4394_s8] sm:$0x3f] }
 0x2c8   : > { %v4177_v39 = vrot.slane %v4162_v0, %v1423_v46 }
 0x2ce   : > { %2188 = vmatmul.mubr.bf16.gmra.mxu0 %v4005_v2  ;;  %2218 = vmatmul.mubr.bf16.gmra.mxu1 %v4077_v63  ;;  %v4167_v2 = vrot.slane %v4162_v0, %v3666_v26 }
 0x2cf   : > { %2197 = vmatprep.mubr.bf16.mxu0 %v4024_v16  ;;  %2227 = vmatprep.mubr.bf16.mxu1 %v4096_v15  ;;  %v4170_v16 = vrot.slane %v4162_v0, %v1419_v44 }
 0x2d6   : > { %2198 = vmatmul.mubr.bf16.gmra.mxu0 %v4029_v18  ;;  %2228 = vmatmul.mubr.bf16.gmra.mxu1 %v4101_v19  ;;  %v4174_v18 = vrot.slane %v4162_v0, %v3663_v25 }
 0x2d7   : > { %2237 = vmatprep.mubr.bf16.mxu1 %v1308_v42 }
 0x2de   : > { %2238 = vmatmul.mubr.bf16.gmra.mxu1 %v1307_v45 }
 0x2df   : > { %2247 = vmatprep.mubr.bf16.mxu1 %v1310_v62 }
 0x2e6   : > { %2248 = vmatmul.mubr.bf16.gmra.mxu1 %v1309_v1 }
 0x346   : > { %v1953_v41 = vpop.f32.mrf.mxu1  ;;  %v2066_v61 = vpop.f32.mrf.mxu0 }
 0x347   : > { %v1954_v6 = vadd.f32 %v1953_v41, %v4167_v2  ;;  %v2067_v26 = vadd.f32 %v2066_v61, %v4170_v16 }
 0x348   : > { %v1955_v63 = vpop.f32.mrf.mxu1  ;;  %v2068_v5 = vpop.f32.mrf.mxu0 }
 0x349   : > { %v1956_v7 = vadd.f32 %v1955_v63, %v4174_v18  ;;  %v2069_v8 = vadd.f32 %v2068_v5, %v4177_v39 }
 0x34a   : > { %v1957_v9 = vpop.f32.mrf.mxu1  ;;  %v2070_v25 = vpop.f32.mrf.mxu0 }
 0x34b   : > { %v2902_v10 = vpack.c.bf16 %v1956_v7, %v1954_v6  ;;  %v2903_v11 = vpack.c.bf16 %v2069_v8, %v2067_v26  ;;  %v1958_v58 = vadd.f32 %v1957_v9, %v4167_v2  ;;  %v2071_v57 = vadd.f32 %v2070_v25, %v4170_v16 }
 0x34c   : > { %v1959_v12 = vpop.f32.mrf.mxu1  ;;  %v2072_v13 = vpop.f32.mrf.mxu0 }
 0x34d   : > { %2546 = vst [vmem:[%s4185_s17] sm:$0xff] %v2902_v10  ;;  %2547 = vst [vmem:[%s4185_s17 + $0x8] sm:$0xff] %v2903_v11  ;;  %v1960_v14 = vadd.f32 %v1959_v12, %v4174_v18  ;;  %v2073_v15 = vadd.f32 %v2072_v13, %v4177_v39 }
 0x34e   : > { %v1963_v17 = vpop.f32.mrf.mxu1  ;;  %v2076_v19 = vpop.f32.mrf.mxu0 }
 0x34f   : > { %v2905_v30 = vpack.c.bf16 %v1960_v14, %v1958_v58  ;;  %v2906_v29 = vpack.c.bf16 %v2073_v15, %v2071_v57  ;;  %v1964_v22 = vadd.f32 %v1963_v17, %v4167_v2  ;;  %v2077_v23 = vadd.f32 %v2076_v19, %v4170_v16 }
 0x350   : > { %v1965_v20 = vpop.f32.mrf.mxu1  ;;  %v2078_v21 = vpop.f32.mrf.mxu0 }
 0x351   : > { %2549 = vst [vmem:[%s4185_s17 + $0x18] sm:$0xff] %v2905_v30  ;;  %2550 = vst [vmem:[%s4185_s17 + $0x20] sm:$0xff] %v2906_v29  ;;  %v1966_v31 = vadd.f32 %v1965_v20, %v4174_v18  ;;  %v2079_v32 = vadd.f32 %v2078_v21, %v4177_v39 }
 0x352   : > { %v1967_v33 = vpop.f32.mrf.mxu1  ;;  %v2080_v34 = vpop.f32.mrf.mxu0 }
 0x353   : > { %v2908_v35 = vpack.c.bf16 %v1966_v31, %v1964_v22  ;;  %v2909_v36 = vpack.c.bf16 %v2079_v32, %v2077_v23  ;;  %v1968_v40 = vadd.f32 %v1967_v33, %v4167_v2  ;;  %v2081_v42 = vadd.f32 %v2080_v34, %v4170_v16 }
 0x354   : > { %v1969_v37 = vpop.f32.mrf.mxu1  ;;  %v2082_v38 = vpop.f32.mrf.mxu0 }
 0x355   : > { %2552 = vst [vmem:[%s4185_s17 + $0x30] sm:$0xff] %v2908_v35  ;;  %2553 = vst [vmem:[%s4185_s17 + $0x38] sm:$0xff] %v2909_v36  ;;  %v1970_v43 = vadd.f32 %v1969_v37, %v4174_v18  ;;  %v2083_v45 = vadd.f32 %v2082_v38, %v4177_v39 }
 0x356   : > { %v1973_v47 = vpop.f32.mrf.mxu1  ;;  %v2086_v48 = vpop.f32.mrf.mxu0 }
 0x357   : > { %v2911_v49 = vpack.c.bf16 %v1970_v43, %v1968_v40  ;;  %v2912_v50 = vpack.c.bf16 %v2083_v45, %v2081_v42  ;;  %v1974_v53 = vadd.f32 %v1973_v47, %v4167_v2  ;;  %v2087_v54 = vadd.f32 %v2086_v48, %v4170_v16 }
 0x358   : > { %v1975_v51 = vpop.f32.mrf.mxu1  ;;  %v2088_v52 = vpop.f32.mrf.mxu0 }
 0x359   : > { %2555 = vst [vmem:[%s4185_s17 + $0x48] sm:$0xff] %v2911_v49  ;;  %2556 = vst [vmem:[%s4185_s17 + $0x50] sm:$0xff] %v2912_v50  ;;  %v1976_v55 = vadd.f32 %v1975_v51, %v4174_v18  ;;  %v2089_v56 = vadd.f32 %v2088_v52, %v4177_v39 }
 0x35a   : > { %v1977_v59 = vpop.f32.mrf.mxu1  ;;  %v2090_v28 = vpop.f32.mrf.mxu0 }
 0x35b   : > { %v2914_v60 = vpack.c.bf16 %v1976_v55, %v1974_v53  ;;  %v2915_v62 = vpack.c.bf16 %v2089_v56, %v2087_v54  ;;  %v1978_v3 = vadd.f32 %v1977_v59, %v4167_v2  ;;  %v2091_v4 = vadd.f32 %v2090_v28, %v4170_v16 }
 0x35c   : > { %v1979_v27 = vpop.f32.mrf.mxu1  ;;  %v2092_v1 = vpop.f32.mrf.mxu0 }
 0x35d   : > { %2558 = vst [vmem:[%s4185_s17 + $0x60] sm:$0xff] %v2914_v60  ;;  %2559 = vst [vmem:[%s4185_s17 + $0x68] sm:$0xff] %v2915_v62  ;;  %v1980_v44 = vadd.f32 %v1979_v27, %v4174_v18  ;;  %v2093_v46 = vadd.f32 %v2092_v1, %v4177_v39 }
 0x35e   : > { %v1983_v41 = vpop.f32.mrf.mxu1  ;;  %v2096_v61 = vpop.f32.mrf.mxu0 }
 0x35f   : > { %v2917_v63 = vpack.c.bf16 %v1980_v44, %v1978_v3  ;;  %v2918_v5 = vpack.c.bf16 %v2093_v46, %v2091_v4  ;;  %v1984_v7 = vadd.f32 %v1983_v41, %v4167_v2  ;;  %v2097_v8 = vadd.f32 %v2096_v61, %v4170_v16 }
 0x360   : > { %v1985_v6 = vpop.f32.mrf.mxu1  ;;  %v2098_v26 = vpop.f32.mrf.mxu0 }
 0x361   : > { %2561 = vst [vmem:[%s4185_s17 + $0x78] sm:$0xff] %v2917_v63  ;;  %2562 = vst [vmem:[%s4185_s17 + $0x80] sm:$0xff] %v2918_v5  ;;  %v1986_v9 = vadd.f32 %v1985_v6, %v4174_v18  ;;  %v2099_v25 = vadd.f32 %v2098_v26, %v4177_v39 }
 0x362   : > { %v1987_v10 = vpop.f32.mrf.mxu1  ;;  %v2100_v11 = vpop.f32.mrf.mxu0 }
 0x363   : > { %v2920_v12 = vpack.c.bf16 %v1986_v9, %v1984_v7  ;;  %v2921_v13 = vpack.c.bf16 %v2099_v25, %v2097_v8  ;;  %v1988_v14 = vadd.f32 %v1987_v10, %v4167_v2  ;;  %v2101_v15 = vadd.f32 %v2100_v11, %v4170_v16 }
 0x364   : > { %v1989_v58 = vpop.f32.mrf.mxu1  ;;  %v2102_v57 = vpop.f32.mrf.mxu0 }
 0x365   : > { %2564 = vst [vmem:[%s4185_s17 + $0x90] sm:$0xff] %v2920_v12  ;;  %2565 = vst [vmem:[%s4185_s17 + $0x98] sm:$0xff] %v2921_v13  ;;  %v1990_v17 = vadd.f32 %v1989_v58, %v4174_v18  ;;  %v2103_v19 = vadd.f32 %v2102_v57, %v4177_v39 }
 0x366   : > { %v1993_v30 = vpop.f32.mrf.mxu1  ;;  %v2106_v29 = vpop.f32.mrf.mxu0 }
 0x367   : > { %v2923_v20 = vpack.c.bf16 %v1990_v17, %v1988_v14  ;;  %v2924_v21 = vpack.c.bf16 %v2103_v19, %v2101_v15  ;;  %v1994_v31 = vadd.f32 %v1993_v30, %v4167_v2  ;;  %v2107_v32 = vadd.f32 %v2106_v29, %v4170_v16 }
 0x368   : > { %v1995_v22 = vpop.f32.mrf.mxu1  ;;  %v2108_v23 = vpop.f32.mrf.mxu0 }
 0x369   : > { %2567 = vst [vmem:[%s4185_s17 + $0xa8] sm:$0xff] %v2923_v20  ;;  %2568 = vst [vmem:[%s4185_s17 + $0xb0] sm:$0xff] %v2924_v21  ;;  %v1996_v33 = vadd.f32 %v1995_v22, %v4174_v18  ;;  %v2109_v34 = vadd.f32 %v2108_v23, %v4177_v39 }
 0x36a   : > { %v1997_v35 = vpop.f32.mrf.mxu1  ;;  %v2110_v36 = vpop.f32.mrf.mxu0 }
 0x36b   : > { %v2926_v37 = vpack.c.bf16 %v1996_v33, %v1994_v31  ;;  %v2927_v38 = vpack.c.bf16 %v2109_v34, %v2107_v32  ;;  %v1998_v43 = vadd.f32 %v1997_v35, %v4167_v2  ;;  %v2111_v45 = vadd.f32 %v2110_v36, %v4170_v16 }
 0x36c   : > { %v1999_v40 = vpop.f32.mrf.mxu1  ;;  %v2112_v42 = vpop.f32.mrf.mxu0  ;;  %v1427_v33 = vsub.s32 4, %v3660_v24  ;;  %v1431_v34 = vsub.s32 5, %v3660_v24 }
 0x36d   : > { %2570 = vst [vmem:[%s4185_s17 + $0xc0] sm:$0xff] %v2926_v37  ;;  %2571 = vst [vmem:[%s4185_s17 + $0xc8] sm:$0xff] %v2927_v38  ;;  %v2000_v47 = vadd.f32 %v1999_v40, %v4174_v18  ;;  %v2113_v48 = vadd.f32 %v2112_v42, %v4177_v39 }
 0x36e   : > { %v2003_v49 = vpop.f32.mrf.mxu1  ;;  %v2116_v50 = vpop.f32.mrf.mxu0  ;;  %v4274_v24 = vrot.slane %v4162_v0, %v1427_v33 }
 0x36f   : > { %v2929_v51 = vpack.c.bf16 %v2000_v47, %v1998_v43  ;;  %v2930_v52 = vpack.c.bf16 %v2113_v48, %v2111_v45  ;;  %v2004_v55 = vadd.f32 %v2003_v49, %v4167_v2  ;;  %v2117_v56 = vadd.f32 %v2116_v50, %v4170_v16 }
 0x370   : > { %v2005_v53 = vpop.f32.mrf.mxu1  ;;  %v2118_v54 = vpop.f32.mrf.mxu0  ;;  %v4277_v49 = vrot.slane %v4162_v0, %v1431_v34 }
 0x371   : > { %2573 = vst [vmem:[%s4185_s17 + $0xd8] sm:$0xff] %v2929_v51  ;;  %2574 = vst [vmem:[%s4185_s17 + $0xe0] sm:$0xff] %v2930_v52  ;;  %v2006_v59 = vadd.f32 %v2005_v53, %v4174_v18  ;;  %v2119_v28 = vadd.f32 %v2118_v54, %v4177_v39 }
 0x372   : > { %v2007_v60 = vpop.f32.mrf.mxu1  ;;  %v2120_v62 = vpop.f32.mrf.mxu0 }
 0x373   : > { %v2932_v27 = vpack.c.bf16 %v2006_v59, %v2004_v55  ;;  %v2933_v1 = vpack.c.bf16 %v2119_v28, %v2117_v56  ;;  %v2008_v44 = vadd.f32 %v2007_v60, %v4167_v2  ;;  %v2121_v46 = vadd.f32 %v2120_v62, %v4170_v16 }
 0x374   : > { %v2009_v3 = vpop.f32.mrf.mxu1  ;;  %v2122_v4 = vpop.f32.mrf.mxu0 }
 0x375   : > { %2576 = vst [vmem:[%s4185_s17 + $0xf0] sm:$0xff] %v2932_v27  ;;  %2577 = vst [vmem:[%s4185_s17 + $0xf8] sm:$0xff] %v2933_v1  ;;  %v2010_v41 = vadd.f32 %v2009_v3, %v4174_v18  ;;  %v2123_v61 = vadd.f32 %v2122_v4, %v4177_v39 }
 0x376   : > { %v2013_v63 = vpop.f32.mrf.mxu1  ;;  %v2126_v5 = vpop.f32.mrf.mxu0 }
 0x377   : > { %v2935_v6 = vpack.c.bf16 %v2010_v41, %v2008_v44  ;;  %v2936_v26 = vpack.c.bf16 %v2123_v61, %v2121_v46  ;;  %v2014_v9 = vadd.f32 %v2013_v63, %v4167_v2  ;;  %v2127_v25 = vadd.f32 %v2126_v5, %v4170_v16 }
 0x378   : > { %v2015_v7 = vpop.f32.mrf.mxu1  ;;  %v2128_v8 = vpop.f32.mrf.mxu0 }
 0x379   : > { %2579 = vst [vmem:[%s4185_s17 + $0x108] sm:$0xff] %v2935_v6  ;;  %2580 = vst [vmem:[%s4185_s17 + $0x110] sm:$0xff] %v2936_v26  ;;  %v2016_v10 = vadd.f32 %v2015_v7, %v4174_v18  ;;  %v2129_v11 = vadd.f32 %v2128_v8, %v4177_v39 }
 0x37a   : > { %v2017_v12 = vpop.f32.mrf.mxu1  ;;  %v2130_v13 = vpop.f32.mrf.mxu0 }
 0x37b   : > { %v2938_v58 = vpack.c.bf16 %v2016_v10, %v2014_v9  ;;  %v2939_v57 = vpack.c.bf16 %v2129_v11, %v2127_v25  ;;  %v2018_v17 = vadd.f32 %v2017_v12, %v4167_v2  ;;  %v2131_v19 = vadd.f32 %v2130_v13, %v4170_v16 }
 0x37c   : > { %v2019_v14 = vpop.f32.mrf.mxu1  ;;  %v2132_v15 = vpop.f32.mrf.mxu0 }
 0x37d   : > { %2582 = vst [vmem:[%s4185_s17 + $0x120] sm:$0xff] %v2938_v58  ;;  %2583 = vst [vmem:[%s4185_s17 + $0x128] sm:$0xff] %v2939_v57  ;;  %v2020_v30 = vadd.f32 %v2019_v14, %v4174_v18  ;;  %v2133_v29 = vadd.f32 %v2132_v15, %v4177_v39 }
 0x37e   : > { %v2023_v20 = vpop.f32.mrf.mxu1  ;;  %v2136_v21 = vpop.f32.mrf.mxu0 }
 0x37f   : > { %v2941_v22 = vpack.c.bf16 %v2020_v30, %v2018_v17  ;;  %v2942_v23 = vpack.c.bf16 %v2133_v29, %v2131_v19  ;;  %v2024_v35 = vadd.f32 %v2023_v20, %v4167_v2  ;;  %v2137_v36 = vadd.f32 %v2136_v21, %v4170_v16 }
 0x380   : > { %v2025_v31 = vpop.f32.mrf.mxu1  ;;  %v2138_v32 = vpop.f32.mrf.mxu0 }
 0x381   : > { %2585 = vst [vmem:[%s4185_s17 + $0x138] sm:$0xff] %v2941_v22  ;;  %2586 = vst [vmem:[%s4185_s17 + $0x140] sm:$0xff] %v2942_v23  ;;  %v2026_v37 = vadd.f32 %v2025_v31, %v4174_v18  ;;  %v2139_v38 = vadd.f32 %v2138_v32, %v4177_v39 }
 0x382   : > { %v2027_v40 = vpop.f32.mrf.mxu1  ;;  %v2140_v42 = vpop.f32.mrf.mxu0 }
 0x383   : > { %v2944_v43 = vpack.c.bf16 %v2026_v37, %v2024_v35  ;;  %v2945_v45 = vpack.c.bf16 %v2139_v38, %v2137_v36  ;;  %v2028_v50 = vadd.f32 %v2027_v40, %v4167_v2  ;;  %v2141_v51 = vadd.f32 %v2140_v42, %v4170_v16 }
 0x384   : > { %v2029_v47 = vpop.f32.mrf.mxu1  ;;  %v2142_v48 = vpop.f32.mrf.mxu0 }
 0x385   : > { %2588 = vst [vmem:[%s4185_s17 + $0x150] sm:$0xff] %v2944_v43  ;;  %2589 = vst [vmem:[%s4185_s17 + $0x158] sm:$0xff] %v2945_v45  ;;  %v2030_v52 = vadd.f32 %v2029_v47, %v4174_v18  ;;  %v2143_v53 = vadd.f32 %v2142_v48, %v4177_v39 }
 0x386   : > { %v2179_v54 = vpop.f32.mrf.mxu0  ;;  %v2209_v55 = vpop.f32.mrf.mxu1 }
 0x387   : > { %v2947_v56 = vpack.c.bf16 %v2030_v52, %v2028_v50  ;;  %v2948_v59 = vpack.c.bf16 %v2143_v53, %v2141_v51  ;;  %v2180_v0 = vadd.f32 %v2179_v54, %v4274_v24  ;;  %v2210_v2 = vadd.f32 %v2209_v55, %v4274_v24 }
 0x388   : > { %v2181_v28 = vpop.f32.mrf.mxu0  ;;  %v2211_v60 = vpop.f32.mrf.mxu1 }
 0x389   : > { %2591 = vst [vmem:[%s4185_s17 + $0x168] sm:$0xff] %v2947_v56  ;;  %2592 = vst [vmem:[%s4185_s17 + $0x170] sm:$0xff] %v2948_v59  ;;  %v2182_v16 = vadd.f32 %v2181_v28, %v4277_v49  ;;  %v2212_v18 = vadd.f32 %v2211_v60, %v4277_v49 }
 0x38a   : > { %v2183_v62 = vpop.f32.mrf.mxu0  ;;  %v2213_v39 = vpop.f32.mrf.mxu1 }
 0x38b   : > { %v2904_v27 = vpack.c.bf16 %v2182_v16, %v2180_v0  ;;  %v2922_v1 = vpack.c.bf16 %v2212_v18, %v2210_v2  ;;  %v2184_v44 = vadd.f32 %v2183_v62, %v4274_v24  ;;  %v2214_v46 = vadd.f32 %v2213_v39, %v4274_v24 }
 0x38c   : > { %v2185_v3 = vpop.f32.mrf.mxu0  ;;  %v2215_v4 = vpop.f32.mrf.mxu1 }
 0x38d   : > { %2548 = vst [vmem:[%s4185_s17 + $0x10] sm:$0xff] %v2904_v27  ;;  %2566 = vst [vmem:[%s4185_s17 + $0xa0] sm:$0xff] %v2922_v1  ;;  %v2186_v41 = vadd.f32 %v2185_v3, %v4277_v49  ;;  %v2216_v61 = vadd.f32 %v2215_v4, %v4277_v49 }
 0x38e   : > { %v2189_v63 = vpop.f32.mrf.mxu0  ;;  %v2219_v5 = vpop.f32.mrf.mxu1 }
 0x38f   : > { %v2907_v6 = vpack.c.bf16 %v2186_v41, %v2184_v44  ;;  %v2925_v26 = vpack.c.bf16 %v2216_v61, %v2214_v46  ;;  %v2190_v9 = vadd.f32 %v2189_v63, %v4274_v24  ;;  %v2220_v25 = vadd.f32 %v2219_v5, %v4274_v24 }
 0x390   : > { %v2191_v7 = vpop.f32.mrf.mxu0  ;;  %v2221_v8 = vpop.f32.mrf.mxu1 }
 0x391   : > { %2551 = vst [vmem:[%s4185_s17 + $0x28] sm:$0xff] %v2907_v6  ;;  %2569 = vst [vmem:[%s4185_s17 + $0xb8] sm:$0xff] %v2925_v26  ;;  %v2192_v10 = vadd.f32 %v2191_v7, %v4277_v49  ;;  %v2222_v11 = vadd.f32 %v2221_v8, %v4277_v49 }
 0x392   : > { %v2193_v12 = vpop.f32.mrf.mxu0  ;;  %v2223_v13 = vpop.f32.mrf.mxu1 }
 0x393   : > { %v2910_v58 = vpack.c.bf16 %v2192_v10, %v2190_v9  ;;  %v2928_v57 = vpack.c.bf16 %v2222_v11, %v2220_v25  ;;  %v2194_v17 = vadd.f32 %v2193_v12, %v4274_v24  ;;  %v2224_v19 = vadd.f32 %v2223_v13, %v4274_v24 }
 0x394   : > { %v2195_v14 = vpop.f32.mrf.mxu0  ;;  %v2225_v15 = vpop.f32.mrf.mxu1 }
 0x395   : > { %2554 = vst [vmem:[%s4185_s17 + $0x40] sm:$0xff] %v2910_v58  ;;  %2572 = vst [vmem:[%s4185_s17 + $0xd0] sm:$0xff] %v2928_v57  ;;  %v2196_v30 = vadd.f32 %v2195_v14, %v4277_v49  ;;  %v2226_v29 = vadd.f32 %v2225_v15, %v4277_v49 }
 0x396   : > { %v2199_v20 = vpop.f32.mrf.mxu0  ;;  %v2229_v21 = vpop.f32.mrf.mxu1 }
 0x397   : > { %v2913_v22 = vpack.c.bf16 %v2196_v30, %v2194_v17  ;;  %v2931_v23 = vpack.c.bf16 %v2226_v29, %v2224_v19  ;;  %v2200_v33 = vadd.f32 %v2199_v20, %v4274_v24  ;;  %v2230_v34 = vadd.f32 %v2229_v21, %v4274_v24 }
 0x398   : > { %v2201_v31 = vpop.f32.mrf.mxu0  ;;  %v2231_v32 = vpop.f32.mrf.mxu1 }
 0x399   : > { %2557 = vst [vmem:[%s4185_s17 + $0x58] sm:$0xff] %v2913_v22  ;;  %2575 = vst [vmem:[%s4185_s17 + $0xe8] sm:$0xff] %v2931_v23  ;;  %v2202_v35 = vadd.f32 %v2201_v31, %v4277_v49  ;;  %v2232_v36 = vadd.f32 %v2231_v32, %v4277_v49 }
 0x39a   : > { %v2203_v37 = vpop.f32.mrf.mxu0  ;;  %v2233_v38 = vpop.f32.mrf.mxu1 }
 0x39b   : > { %v2916_v40 = vpack.c.bf16 %v2202_v35, %v2200_v33  ;;  %v2934_v42 = vpack.c.bf16 %v2232_v36, %v2230_v34  ;;  %v2204_v47 = vadd.f32 %v2203_v37, %v4274_v24  ;;  %v2234_v48 = vadd.f32 %v2233_v38, %v4274_v24 }
 0x39c   : > { %v2205_v43 = vpop.f32.mrf.mxu0  ;;  %v2235_v45 = vpop.f32.mrf.mxu1 }
 0x39d   : > { %2560 = vst [vmem:[%s4185_s17 + $0x70] sm:$0xff] %v2916_v40  ;;  %2578 = vst [vmem:[%s4185_s17 + $0x100] sm:$0xff] %v2934_v42  ;;  %v2206_v50 = vadd.f32 %v2205_v43, %v4277_v49  ;;  %v2236_v51 = vadd.f32 %v2235_v45, %v4277_v49 }
 0x39e   : > { %v2239_v52 = vpop.f32.mrf.mxu1 }
 0x39f   : > { %v2919_v53 = vpack.c.bf16 %v2206_v50, %v2204_v47  ;;  %v2937_v54 = vpack.c.bf16 %v2236_v51, %v2234_v48  ;;  %v2240_v56 = vadd.f32 %v2239_v52, %v4274_v24 }
 0x3a0   : > { %v2241_v55 = vpop.f32.mrf.mxu1 }
 0x3a1   : > { %2563 = vst [vmem:[%s4185_s17 + $0x88] sm:$0xff] %v2919_v53  ;;  %2581 = vst [vmem:[%s4185_s17 + $0x118] sm:$0xff] %v2937_v54  ;;  %v2242_v59 = vadd.f32 %v2241_v55, %v4277_v49 }
 0x3a2   : > { %v2243_v28 = vpop.f32.mrf.mxu1 }
 0x3a3   : > { %v2940_v60 = vpack.c.bf16 %v2242_v59, %v2240_v56  ;;  %v2244_v2 = vadd.f32 %v2243_v28, %v4274_v24 }
 0x3a4   : > { %v2245_v0 = vpop.f32.mrf.mxu1 }
 0x3a5   : > { %2584 = vst [vmem:[%s4185_s17 + $0x130] sm:$0xff] %v2940_v60  ;;  %v2246_v16 = vadd.f32 %v2245_v0, %v4277_v49 }
 0x3a6   : > { %v2249_v18 = vpop.f32.mrf.mxu1 }
 0x3a7   : > { %v2943_v62 = vpack.c.bf16 %v2246_v16, %v2244_v2  ;;  %v2250_v27 = vadd.f32 %v2249_v18, %v4274_v24 }
 0x3a8   : > { %v2251_v39 = vpop.f32.mrf.mxu1 }
 0x3a9   : > { %2587 = vst [vmem:[%s4185_s17 + $0x148] sm:$0xff] %v2943_v62  ;;  %v2252_v1 = vadd.f32 %v2251_v39, %v4277_v49 }
 0x3aa   : > { %v2253_v3 = vpop.f32.mrf.mxu1 }
 0x3ab   : > { %v2946_v4 = vpack.c.bf16 %v2252_v1, %v2250_v27  ;;  %v2254_v46 = vadd.f32 %v2253_v3, %v4274_v24 }
 0x3ac   : > { %v2255_v44 = vpop.f32.mrf.mxu1 }
 0x3ad   : > { %2590 = vst [vmem:[%s4185_s17 + $0x160] sm:$0xff] %v2946_v4  ;;  %v2256_v41 = vadd.f32 %v2255_v44, %v4277_v49 }
 0x3af   : > { %v2949_v61 = vpack.c.bf16 %v2256_v41, %v2254_v46 }
 0x3b1   : > { %2593 = vst [vmem:[%s4185_s17 + $0x178] sm:$0xff] %v2949_v61 }
 0x3b2   : > { %3285 = shalt.err (!%p3282_p3)
}
 0x3b3   : > { %s3286_s23 = scalar_lea.hbm %s4339_s25, 6144  ;;  %s3290_s21 = scalar_lea.hbm %s4395_s9, 24576 }
 0x3b4   : > { %p3287_p4 = scmp.ne.s32.totalorder %s4339_s25, %s3286_s23  ;;  %p3291_p9 = scmp.lt.s32.totalorder %s4339_s25, %s4395_s9 }
 0x3b5   : > { %p3292_p10 = scmp.lt.s32.totalorder %s3290_s21, %s3286_s23 }
 0x3b6   : > { %p3288_p7 = pnand %p3287_p4, %p3426_p5 }
 0x3b7   : > { %p3293_p11 = por %p3292_p10, %p3291_p9 }
 0x3b8   : > { %p3289_p8 = pneg %p3288_p7 }
 0x3ba   : > { %p3294_p12 = pnand %p3293_p11, %p3289_p8 }
 0x3bc   : > { %3297 = shalt.err (!%p3294_p12)
}
 0x3bd   : > { %s3336_s26 = smov 384   ;;  %s3337_s27 = smov 24  }
 0x3be   : > { %2984 = dma.vmem_to_hbm [thread:$0]  (%p3426_p5), %s4341_s22, 6144, %s4339_s25, %s4346_s13, %s3336_s26, %s3336_s26, %s3337_s27  }
 0x3bf PF: > { %p2990_p13 = scmp.ge.s32.totalorder %s3332_s12, 2  ;;  %s2624_s29 = sand.u32 1, %s3320_s30  }
 0x3c0   : > { %s2625_s14 = scalar_lea.sflag [#allocation3], %s2624_s29 }
 0x3c1   : > { %p2987_p0 = pnand %p2990_p13, %p3430_p6 }
 0x3c3   : > { %p2988_p1 = pneg %p2987_p0 }
 0x3c5   : > { %3315 = dma.done.wait (%p2988_p1), %s2625_s14, 6144  }
 0x3c6   : > { %3317 = vsyncadd (%p2988_p1), %s2625_s14, 4294961152  ;;  %p19_p2 = scmp.ge.s32.totalorder %s3413_s15, 6   ;;  %s4398_s30 = smov %s3324_s10 }
 0x3c7   : > { %s4399_s10 = smov %s3328_s11  ;;  %s4400_s11 = smov %s3424_s18 }
 0x3c8   : > { %s4401_s12 = smov %s3413_s15  ;;  %21 = sbr.rel (!%p19_p2) target bundleno = 3 (0x3), region = 91 }
 0x3cd   :  { %2630 = vsyncpa [#allocation3], 1 }
 0x3ce   :  { %2632 = vsyncpa [#allocation3 + $0x1], 1 }

</bundles_post_ra>
